<compile_context>
chip_gen: v7x
topology: tpu7x:2x2x1
jax: 0.10.0
libtpu: 0.0.40
codegen_flags: <defaults>
</compile_context>

<pallas_src>
import functools

import jax
import jax.numpy as jnp
from jax.experimental import pallas as pl
from jax.experimental.pallas import tpu as pltpu


def _round_up(x, m):
    return ((x + m - 1) // m) * m


# ---------------------------------------------------------------------------
# Fused GCN stack kernel: 3x (GCNConv + ReLU) + global mean pool, G graphs / step.
# ---------------------------------------------------------------------------
def _gcn_stack_kernel(x_ref, adj_ref, poolw_ref, *rest, num_layers):
    """x_ref: [G,N,F0] bf16, adj_ref: [G,N,N] bf16 (A+I), poolw_ref: [G,1,N] f32,
    rest = (w1,b1,w2,b2,...,out_ref); out_ref: [G,F_last] f32."""
    out_ref = rest[-1]
    wb_refs = rest[:-1]

    adj = adj_ref[...]                                        # [G,N,N] bf16
    gcount, nnodes, _ = adj.shape

    # Degree normalization computed ONCE for the whole stack.
    deg = jnp.sum(adj.astype(jnp.float32), axis=-1, keepdims=True)   # [G,N,1]
    dinv = jax.lax.rsqrt(jnp.maximum(deg, 1.0))

    h = x_ref[...].astype(jnp.float32)                        # [G,N,F0]
    for layer in range(num_layers):
        w = wb_refs[2 * layer][...]                           # [Fin,Fout] bf16
        b = wb_refs[2 * layer + 1][...]                       # [1,Fout]   f32
        fin, fout = w.shape
        # Feature transform as one big MXU matmul over all G*N node rows.
        xw = jnp.dot(h.reshape(gcount * nnodes, fin).astype(jnp.bfloat16), w,
                     preferred_element_type=jnp.float32)
        xw = xw.reshape(gcount, nnodes, fout)
        # D^{-1/2} A_hat D^{-1/2} (X W) == dinv * (A_hat @ (dinv * XW)): no [N,N] temp.
        msg = (dinv * xw).astype(jnp.bfloat16)
        agg = jnp.einsum('gnm,gmo->gno', adj, msg,
                         preferred_element_type=jnp.float32)
        h = jnp.maximum(dinv * agg + b, 0.0)                  # ReLU every layer

    # Global mean pool as an MXU contraction (pool weights already mask/count).
    poolw = poolw_ref[...].astype(jnp.bfloat16)               # [G,1,N]
    pooled = jnp.einsum('gxn,gnf->gxf', poolw, h.astype(jnp.bfloat16),
                        preferred_element_type=jnp.float32)   # [G,1,F_last]
    out_ref[...] = pooled[:, 0, :].astype(out_ref.dtype)


def _prepare_graphs(x, adj_hat, mask, f0_pad):
    """Pad node dim to x8, feature dim to the padded weight width, build pool weights."""
    B, N, F0 = x.shape
    Np = _round_up(max(N, 8), 8)
    x_p = jnp.pad(x, ((0, 0), (0, Np - N), (0, f0_pad - F0)))
    adj_p = jnp.pad(adj_hat, ((0, 0), (0, Np - N), (0, Np - N)))
    m = mask[..., 0] if mask.ndim == 3 else mask              # [B,N]
    m_p = jnp.pad(m.astype(jnp.float32), ((0, 0), (0, Np - N)))
    counts = jnp.maximum(jnp.sum(m_p, axis=1, keepdims=True), 1.0)
    poolw = m_p / counts                                      # [B,Np] f32
    return x_p.astype(jnp.bfloat16), adj_p.astype(jnp.bfloat16), poolw


def gcn_model_forward(x, adj_hat, mask, weights, biases, *, graphs_per_block=128):
    """x: [B,N,F0] f32, adj_hat: [B,N,N] (A+I), mask: [B,N,1]. Returns [B, F_last_pad]."""
    B = x.shape[0]
    f0_pad = weights[0].shape[0]
    x_p, adj_p, poolw = _prepare_graphs(x, adj_hat, mask, f0_pad)
    Np = x_p.shape[1]
    num_layers = len(weights)
    f_last = weights[-1].shape[1]

    G = min(B, graphs_per_block)
    Bp = _round_up(B, G)
    if Bp != B:
        pad = Bp - B
        x_p = jnp.pad(x_p, ((0, pad), (0, 0), (0, 0)))
        adj_p = jnp.pad(adj_p, ((0, pad), (0, 0), (0, 0)))
        poolw = jnp.pad(poolw, ((0, pad), (0, 0)))
    poolw3 = poolw.reshape(Bp, 1, Np)

    in_specs = [
        pl.BlockSpec((G, Np, f0_pad), lambda b: (b, 0, 0)),
        pl.BlockSpec((G, Np, Np), lambda b: (b, 0, 0)),
        pl.BlockSpec((G, 1, Np), lambda b: (b, 0, 0)),
    ]
    args = [x_p, adj_p, poolw3]
    for w, bvec in zip(weights, biases):
        fin, fout = w.shape
        in_specs.append(pl.BlockSpec((fin, fout), lambda b: (0, 0)))
        in_specs.append(pl.BlockSpec((1, fout), lambda b: (0, 0)))
        args.append(w)
        args.append(bvec.reshape(1, fout))

    kernel = functools.partial(_gcn_stack_kernel, num_layers=num_layers)
    out = pl.pallas_call(
        kernel,
        out_shape=jax.ShapeDtypeStruct((Bp, f_last), jnp.float32),
        grid=(Bp // G,),
        in_specs=in_specs,
        out_specs=pl.BlockSpec((G, f_last), lambda b: (b, 0)),
        compiler_params=pltpu.CompilerParams(
            dimension_semantics=("parallel",),
            vmem_limit_bytes=32 * 1024 * 1024),
    )(*args)
    return out[:B]


# ---------------------------------------------------------------------------
# Fused ResLinearBlock kernel (sequence branch), row-tiled grid.
# ---------------------------------------------------------------------------
def _res_linear_kernel(x_ref, w_in_ref, b_in_ref, w_h_ref, b_h_ref,
                       w_out_ref, b_out_ref, out_ref, *, num_hidden):
    def mm(a, w):
        return jnp.dot(a.astype(jnp.bfloat16), w, preferred_element_type=jnp.float32)

    # Dropout layers are identity in inference mode.
    h = jnp.maximum(mm(x_ref[...], w_in_ref[...]) + b_in_ref[...], 0.0)
    last = h
    for i in range(num_hidden):                    # static unroll (8 layers)
        if i != 0 and i % 2 == 0:
            h = h + last
        h = jnp.maximum(mm(h, w_h_ref[i]) + b_h_ref[i], 0.0)
        if i != 0 and i % 2 == 0:
            last = h
    out = mm(h, w_out_ref[...]) + b_out_ref[...]
    out_ref[...] = out.astype(out_ref.dtype)


def res_linear_block(x, params, *, block_rows=256):
    w_in, b_in, w_h, b_h, w_out, b_out = params
    M, din = x.shape
    L, hid = w_h.shape[0], w_h.shape[-1]
    dout = w_out.shape[1]
    TM = M if M <= block_rows else block_rows
    Mp = _round_up(M, TM)
    x_p = jnp.pad(x, ((0, Mp - M), (0, 0)))

    kernel = functools.partial(_res_linear_kernel, num_hidden=L)
    out = pl.pallas_call(
        kernel,
        out_shape=jax.ShapeDtypeStruct((Mp, dout), jnp.float32),
        grid=(Mp // TM,),
        in_specs=[
            pl.BlockSpec((TM, din), lambda i: (i, 0)),
            pl.BlockSpec((din, hid), lambda i: (0, 0)),
            pl.BlockSpec((1, hid), lambda i: (0, 0)),
            pl.BlockSpec((L, hid, hid), lambda i: (0, 0, 0)),
            pl.BlockSpec((L, 1, hid), lambda i: (0, 0, 0)),
            pl.BlockSpec((hid, dout), lambda i: (0, 0)),
            pl.BlockSpec((1, dout), lambda i: (0, 0)),
        ],
        out_specs=pl.BlockSpec((TM, dout), lambda i: (i, 0)),
        compiler_params=pltpu.CompilerParams(
            dimension_semantics=("parallel",),
            vmem_limit_bytes=32 * 1024 * 1024),
    )(x_p, w_in, b_in.reshape(1, -1), w_h, b_h.reshape(L, 1, -1),
      w_out, b_out.reshape(1, -1))
    return out[:M]


# ---------------------------------------------------------------------------
# Fused concat + LinearBlock head: relu(seq@W1s + graph@W1g + b1) @ W2 + b2.
# ---------------------------------------------------------------------------
def _fused_head_kernel(seq_ref, graph_ref, w1s_ref, w1g_ref, b1_ref,
                       w2_ref, b2_ref, out_ref):
    def mm(a, w):
        return jnp.dot(a.astype(jnp.bfloat16), w, preferred_element_type=jnp.float32)

    h = jnp.maximum(mm(seq_ref[...], w1s_ref[...])
                    + mm(graph_ref[...], w1g_ref[...]) + b1_ref[...], 0.0)
    out = mm(h, w2_ref[...]) + b2_ref[...]
    out_ref[...] = out.astype(out_ref.dtype)


def fused_output_head(seq_emb, graph_emb, w1s, w1g, b1, w2, b2, *, block_rows=256):
    M, ds = seq_emb.shape
    dg = graph_emb.shape[1]
    hid = w1s.shape[1]
    dout = w2.shape[1]
    TM = M if M <= block_rows else block_rows
    Mp = _round_up(M, TM)
    seq_p = jnp.pad(seq_emb, ((0, Mp - M), (0, 0)))
    graph_p = jnp.pad(graph_emb, ((0, Mp - M), (0, 0)))

    out = pl.pallas_call(
        _fused_head_kernel,
        out_shape=jax.ShapeDtypeStruct((Mp, dout), jnp.float32),
        grid=(Mp // TM,),
        in_specs=[
            pl.BlockSpec((TM, ds), lambda i: (i, 0)),
            pl.BlockSpec((TM, dg), lambda i: (i, 0)),
            pl.BlockSpec((ds, hid), lambda i: (0, 0)),
            pl.BlockSpec((dg, hid), lambda i: (0, 0)),
            pl.BlockSpec((1, hid), lambda i: (0, 0)),
            pl.BlockSpec((hid, dout), lambda i: (0, 0)),
            pl.BlockSpec((1, dout), lambda i: (0, 0)),
        ],
        out_specs=pl.BlockSpec((TM, dout), lambda i: (i, 0)),
        compiler_params=pltpu.CompilerParams(
            dimension_semantics=("parallel",),
            vmem_limit_bytes=32 * 1024 * 1024),
    )(seq_p, graph_p, w1s, w1g, b1.reshape(1, -1), w2, b2.reshape(1, -1))
    return out[:M]


# ---------------------------------------------------------------------------
# Parameters + model wrapper.
# ---------------------------------------------------------------------------
def _glorot(key, fin, fout):
    scale = jnp.sqrt(6.0 / (fin + fout))
    return jax.random.uniform(key, (fin, fout), jnp.float32, -scale, scale)


def _small_bias(key, shape):
    return jax.random.uniform(key, shape, jnp.float32, -0.05, 0.05)


class MFCLDTAColdPallas:
    """JAX / Pallas re-implementation of MFCLDTA_cold.forward (inference mode)."""

    def __init__(self, mg_init_dim=78, pg_init_dim=54, embedding_dim=128, *, key):
        drug_graph_dims = [mg_init_dim, mg_init_dim, mg_init_dim * 2, mg_init_dim * 4]
        target_graph_dims = [pg_init_dim, pg_init_dim, pg_init_dim * 2, pg_init_dim * 4]
        drug_graph_pad = [_round_up(d, 128) for d in drug_graph_dims]      # 128,128,256,384
        target_graph_pad = [_round_up(d, 128) for d in target_graph_dims]  # 128,128,128,256
        self.output_dim = embedding_dim
        self.drug_graph_dims = drug_graph_dims
        self.target_graph_dims = target_graph_dims

        keys = iter(jax.random.split(key, 64))

        def gcn_params(dims, dims_pad):
            ws, bs = [], []
            for i in range(len(dims) - 1):
                w = _glorot(next(keys), dims[i], dims[i + 1])
                w = jnp.pad(w, ((0, dims_pad[i] - dims[i]),
                                (0, dims_pad[i + 1] - dims[i + 1])))
                b = _small_bias(next(keys), (dims[i + 1],))
                b = jnp.pad(b, (0, dims_pad[i + 1] - dims[i + 1]))
                ws.append(w.astype(jnp.bfloat16))
                bs.append(b)                                   # f32
            return ws, bs

        self.drug_gcn_w, self.drug_gcn_b = gcn_params(drug_graph_dims, drug_graph_pad)
        self.target_gcn_w, self.target_gcn_b = gcn_params(target_graph_dims, target_graph_pad)

        def res_params(in_dim, hidden, out_dim, layers=8):
            w_in = _glorot(next(keys), in_dim, hidden).astype(jnp.bfloat16)
            b_in = _small_bias(next(keys), (hidden,))
            w_h = jnp.stack([_glorot(next(keys), hidden, hidden)
                             for _ in range(layers)]).astype(jnp.bfloat16)
            b_h = _small_bias(next(keys), (layers, hidden))
            w_out = _glorot(next(keys), hidden, out_dim).astype(jnp.bfloat16)
            b_out = _small_bias(next(keys), (out_dim,))
            return (w_in, b_in, w_h, b_h, w_out, b_out)

        self.drug_seq_params = res_params(384, 256, 256)
        self.target_seq_params = res_params(768, 256, 256)

        def head_params(seq_dim, graph_dim, graph_dim_pad, hidden, out_dim):
            w1 = _glorot(next(keys), seq_dim + graph_dim, hidden)
            w1_seq = w1[:seq_dim]
            w1_graph = jnp.pad(w1[seq_dim:], ((0, graph_dim_pad - graph_dim), (0, 0)))
            b1 = _small_bias(next(keys), (hidden,))
            w2 = _glorot(next(keys), hidden, out_dim).astype(jnp.bfloat16)
            b2 = _small_bias(next(keys), (out_dim,))
            return (w1_seq.astype(jnp.bfloat16), w1_graph.astype(jnp.bfloat16),
                    b1, w2, b2)

        self.drug_head_params = head_params(256, drug_graph_dims[-1],
                                            drug_graph_pad[-1], 1024, embedding_dim)
        self.target_head_params = head_params(256, target_graph_dims[-1],
                                              target_graph_pad[-1], 1024, embedding_dim)

    def __call__(self, drug_graphs, target_graphs):
        """drug_graphs / target_graphs = (x, adj_hat, mask, seq_x)."""
        dx, dadj, dmask, dseq = drug_graphs
        tx, tadj, tmask, tseq = target_graphs

        drug_seq_emb = res_linear_block(dseq, self.drug_seq_params)          # [Bd,256]
        target_seq_emb = res_linear_block(tseq, self.target_seq_params)      # [Bt,256]

        drug_graph_emb = gcn_model_forward(dx, dadj, dmask,
                                           self.drug_gcn_w, self.drug_gcn_b)       # [Bd,384]
        target_graph_emb = gcn_model_forward(tx, tadj, tmask,
                                             self.target_gcn_w, self.target_gcn_b)  # [Bt,256]

        drug_out = fused_output_head(drug_seq_emb, drug_graph_emb,
                                     *self.drug_head_params)
        target_out = fused_output_head(target_seq_emb, target_graph_emb,
                                       *self.target_head_params)
        return drug_out, target_out


# ---------------------------------------------------------------------------
# Pure-JAX reference (same folded-dinv / bf16-operand math; validates kernels).
# ---------------------------------------------------------------------------
def _ref_gcn(x_bf, adj_bf, poolw, ws, bs):
    deg = jnp.sum(adj_bf.astype(jnp.float32), axis=-1, keepdims=True)
    dinv = jax.lax.rsqrt(jnp.maximum(deg, 1.0))
    h = x_bf.astype(jnp.float32)
    for w, b in zip(ws, bs):
        xw = jnp.einsum('gnf,fo->gno', h.astype(jnp.bfloat16), w,
                        preferred_element_type=jnp.float32)
        agg = jnp.einsum('gnm,gmo->gno', adj_bf, (dinv * xw).astype(jnp.bfloat16),
                         preferred_element_type=jnp.float32)
        h = jnp.maximum(dinv * agg + b, 0.0)
    pooled = jnp.einsum('gxn,gnf->gxf', poolw[:, None, :].astype(jnp.bfloat16),
                        h.astype(jnp.bfloat16), preferred_element_type=jnp.float32)
    return pooled[:, 0, :]


def _ref_res_linear(x, params):
    w_in, b_in, w_h, b_h, w_out, b_out = params
    mm = lambda a, w: jnp.dot(a.astype(jnp.bfloat16), w,
                              preferred_element_type=jnp.float32)
    h = jnp.maximum(mm(x, w_in) + b_in, 0.0)
    last = h
    for i in range(w_h.shape[0]):
        if i != 0 and i % 2 == 0:
            h = h + last
        h = jnp.maximum(mm(h, w_h[i]) + b_h[i], 0.0)
        if i != 0 and i % 2 == 0:
            last = h
    return mm(h, w_out) + b_out


def _ref_head(seq, graph, w1s, w1g, b1, w2, b2):
    mm = lambda a, w: jnp.dot(a.astype(jnp.bfloat16), w,
                              preferred_element_type=jnp.float32)
    h = jnp.maximum(mm(seq, w1s) + mm(graph, w1g) + b1, 0.0)
    return mm(h, w2) + b2


# ---------------------------------------------------------------------------
# Demo / sanity check.
# ---------------------------------------------------------------------------
if __name__ == "__main__":
    key = jax.random.PRNGKey(0)
    k_params, k_dx, k_dadj, k_dseq, k_tx, k_tadj, k_tseq = jax.random.split(key, 7)

    mg_init_dim, pg_init_dim, embedding_dim = 78, 54, 128
    Bd, Nd = 2, 16        # 2 drug graphs, up to 16 nodes each (dense-padded)
    Bt, Nt = 2, 24        # 2 target graphs, up to 24 nodes each

    def make_graphs(kx, kadj, B, N, F, valid_counts):
        x = jax.random.normal(kx, (B, N, F), jnp.float32)
        raw = jax.random.uniform(kadj, (B, N, N))
        adj = (raw < 0.3).astype(jnp.float32)
        adj = jnp.maximum(adj, jnp.swapaxes(adj, 1, 2))          # symmetric
        adj = adj * (1.0 - jnp.eye(N, dtype=jnp.float32))        # no explicit self loops
        node_ids = jnp.arange(N)
        mask = (node_ids[None, :] < jnp.asarray(valid_counts)[:, None]).astype(jnp.float32)
        x = x * mask[:, :, None]
        adj = adj * mask[:, :, None] * mask[:, None, :]
        adj_hat = adj + jnp.eye(N, dtype=jnp.float32)[None]      # GCNConv adds self loops
        return x, adj_hat, mask[:, :, None]

    dx, dadj, dmask = make_graphs(k_dx, k_dadj, Bd, Nd, mg_init_dim, [16, 12])
    tx, tadj, tmask = make_graphs(k_tx, k_tadj, Bt, Nt, pg_init_dim, [24, 20])
    dseq = jax.random.normal(k_dseq, (Bd, 384), jnp.float32)     # drug seq features
    tseq = jax.random.normal(k_tseq, (Bt, 768), jnp.float32)     # target seq features

    model = MFCLDTAColdPallas(mg_init_dim, pg_init_dim, embedding_dim, key=k_params)

    drug_out, target_out = model((dx, dadj, dmask, dseq), (tx, tadj, tmask, tseq))
    jax.block_until_ready((drug_out, target_out))
    assert drug_out.shape == (Bd, embedding_dim)
    assert target_out.shape == (Bt, embedding_dim)

    # Sanity check against the pure-JAX reference of the same math.
    d_seq_ref = _ref_res_linear(dseq, model.drug_seq_params)
    t_seq_ref = _ref_res_linear(tseq, model.target_seq_params)

    d_xp, d_adjp, d_poolw = _prepare_graphs(dx, dadj, dmask, model.drug_gcn_w[0].shape[0])
    t_xp, t_adjp, t_poolw = _prepare_graphs(tx, tadj, tmask, model.target_gcn_w[0].shape[0])
    d_g_ref = _ref_gcn(d_xp, d_adjp, d_poolw, model.drug_gcn_w, model.drug_gcn_b)
    t_g_ref = _ref_gcn(t_xp, t_adjp, t_poolw, model.target_gcn_w, model.target_gcn_b)

    d_ref = _ref_head(d_seq_ref, d_g_ref, *model.drug_head_params)
    t_ref = _ref_head(t_seq_ref, t_g_ref, *model.target_head_params)

    assert jnp.allclose(drug_out, d_ref, atol=2e-2, rtol=2e-2)
    assert jnp.allclose(target_out, t_ref, atol=2e-2, rtol=2e-2)

    print("KERNEL_OK")
</pallas_src>

<mosaic_0001>
module attributes {stable_mosaic.version = 11 : i64} {
  func.func @_res_linear_kernel(%arg0: i32, %arg1: memref<2x384xf32, #tpu.memory_space<vmem>>, %arg2: memref<384x256xbf16, #tpu.memory_space<vmem>>, %arg3: memref<1x256xf32, #tpu.memory_space<vmem>>, %arg4: memref<8x256x256xbf16, #tpu.memory_space<vmem>>, %arg5: memref<8x1x256xf32, #tpu.memory_space<vmem>>, %arg6: memref<256x256xbf16, #tpu.memory_space<vmem>>, %arg7: memref<1x256xf32, #tpu.memory_space<vmem>>, %arg8: memref<2x256xf32, #tpu.memory_space<vmem>>) attributes {dimension_semantics = [#tpu.dimension_semantics<parallel>], iteration_bounds = array<i64: 1>, scalar_prefetch = 0 : i64, scratch_operands = 0 : i64, tpu.core_type = #tpu.core_type<tc>, window_params = [{transform_indices = @transform_0, window_bounds = array<i64: 2, 384>}, {pipeline_mode = #tpu.pipeline_mode<synchronous>, transform_indices = @transform_1, window_bounds = array<i64: 384, 256>}, {pipeline_mode = #tpu.pipeline_mode<synchronous>, transform_indices = @transform_2, window_bounds = array<i64: 1, 256>}, {pipeline_mode = #tpu.pipeline_mode<synchronous>, transform_indices = @transform_3, window_bounds = array<i64: 8, 256, 256>}, {pipeline_mode = #tpu.pipeline_mode<synchronous>, transform_indices = @transform_4, window_bounds = array<i64: 8, 1, 256>}, {pipeline_mode = #tpu.pipeline_mode<synchronous>, transform_indices = @transform_5, window_bounds = array<i64: 256, 256>}, {pipeline_mode = #tpu.pipeline_mode<synchronous>, transform_indices = @transform_6, window_bounds = array<i64: 1, 256>}, {transform_indices = @transform_7, window_bounds = array<i64: 2, 256>}]} {
    %c0 = arith.constant 0 : index
    %c0_0 = arith.constant 0 : index
    %0 = vector.load %arg1[%c0, %c0_0] : memref<2x384xf32, #tpu.memory_space<vmem>>, vector<2x384xf32>
    %c0_1 = arith.constant 0 : index
    %c0_2 = arith.constant 0 : index
    %1 = vector.load %arg2[%c0_1, %c0_2] : memref<384x256xbf16, #tpu.memory_space<vmem>>, vector<384x256xbf16>
    %2 = arith.truncf %0 : vector<2x384xf32> to vector<2x384xbf16>
    %cst = arith.constant dense<0.000000e+00> : vector<2x256xf32>
    %3 = tpu.matmul %2, %1, %cst {dimension_numbers = #tpu.dot_dimension_numbers<[1], [0], [0], [1], [0, 0, 1, 1], [], []>} : vector<2x384xbf16>, vector<384x256xbf16>, vector<2x256xf32> -> vector<2x256xf32>
    %c0_3 = arith.constant 0 : index
    %c0_4 = arith.constant 0 : index
    %4 = vector.load %arg3[%c0_3, %c0_4] : memref<1x256xf32, #tpu.memory_space<vmem>>, vector<1x256xf32>
    %5 = vector.broadcast %4 : vector<1x256xf32> to vector<2x256xf32>
    %6 = arith.addf %3, %5 : vector<2x256xf32>
    %cst_5 = arith.constant 0.000000e+00 : f32
    %7 = vector.broadcast %cst_5 : f32 to vector<2x256xf32>
    %8 = arith.maximumf %6, %7 : vector<2x256xf32>
    %c0_6 = arith.constant 0 : index
    %c0_7 = arith.constant 0 : index
    %c0_8 = arith.constant 0 : index
    %9 = vector.load %arg4[%c0_6, %c0_7, %c0_8] : memref<8x256x256xbf16, #tpu.memory_space<vmem>>, vector<1x256x256xbf16>
    %10 = vector.shape_cast %9 : vector<1x256x256xbf16> to vector<256x256xbf16>
    %11 = arith.truncf %8 : vector<2x256xf32> to vector<2x256xbf16>
    %cst_9 = arith.constant dense<0.000000e+00> : vector<2x256xf32>
    %12 = tpu.matmul %11, %10, %cst_9 {dimension_numbers = #tpu.dot_dimension_numbers<[1], [0], [0], [1], [0, 0, 1, 1], [], []>} : vector<2x256xbf16>, vector<256x256xbf16>, vector<2x256xf32> -> vector<2x256xf32>
    %c0_10 = arith.constant 0 : index
    %c0_11 = arith.constant 0 : index
    %c0_12 = arith.constant 0 : index
    %13 = vector.load %arg5[%c0_10, %c0_11, %c0_12] : memref<8x1x256xf32, #tpu.memory_space<vmem>>, vector<1x1x256xf32>
    %14 = vector.shape_cast %13 : vector<1x1x256xf32> to vector<1x256xf32>
    %15 = vector.broadcast %14 : vector<1x256xf32> to vector<2x256xf32>
    %16 = arith.addf %12, %15 : vector<2x256xf32>
    %cst_13 = arith.constant 0.000000e+00 : f32
    %17 = vector.broadcast %cst_13 : f32 to vector<2x256xf32>
    %18 = arith.maximumf %16, %17 : vector<2x256xf32>
    %c1 = arith.constant 1 : index
    %c0_14 = arith.constant 0 : index
    %c0_15 = arith.constant 0 : index
    %19 = vector.load %arg4[%c1, %c0_14, %c0_15] : memref<8x256x256xbf16, #tpu.memory_space<vmem>>, vector<1x256x256xbf16>
    %20 = vector.shape_cast %19 : vector<1x256x256xbf16> to vector<256x256xbf16>
    %21 = arith.truncf %18 : vector<2x256xf32> to vector<2x256xbf16>
    %cst_16 = arith.constant dense<0.000000e+00> : vector<2x256xf32>
    %22 = tpu.matmul %21, %20, %cst_16 {dimension_numbers = #tpu.dot_dimension_numbers<[1], [0], [0], [1], [0, 0, 1, 1], [], []>} : vector<2x256xbf16>, vector<256x256xbf16>, vector<2x256xf32> -> vector<2x256xf32>
    %c1_17 = arith.constant 1 : index
    %c0_18 = arith.constant 0 : index
    %c0_19 = arith.constant 0 : index
    %23 = vector.load %arg5[%c1_17, %c0_18, %c0_19] : memref<8x1x256xf32, #tpu.memory_space<vmem>>, vector<1x1x256xf32>
    %24 = vector.shape_cast %23 : vector<1x1x256xf32> to vector<1x256xf32>
    %25 = vector.broadcast %24 : vector<1x256xf32> to vector<2x256xf32>
    %26 = arith.addf %22, %25 : vector<2x256xf32>
    %cst_20 = arith.constant 0.000000e+00 : f32
    %27 = vector.broadcast %cst_20 : f32 to vector<2x256xf32>
    %28 = arith.maximumf %26, %27 : vector<2x256xf32>
    %29 = arith.addf %28, %8 : vector<2x256xf32>
    %c2 = arith.constant 2 : index
    %c0_21 = arith.constant 0 : index
    %c0_22 = arith.constant 0 : index
    %30 = vector.load %arg4[%c2, %c0_21, %c0_22] : memref<8x256x256xbf16, #tpu.memory_space<vmem>>, vector<1x256x256xbf16>
    %31 = vector.shape_cast %30 : vector<1x256x256xbf16> to vector<256x256xbf16>
    %32 = arith.truncf %29 : vector<2x256xf32> to vector<2x256xbf16>
    %cst_23 = arith.constant dense<0.000000e+00> : vector<2x256xf32>
    %33 = tpu.matmul %32, %31, %cst_23 {dimension_numbers = #tpu.dot_dimension_numbers<[1], [0], [0], [1], [0, 0, 1, 1], [], []>} : vector<2x256xbf16>, vector<256x256xbf16>, vector<2x256xf32> -> vector<2x256xf32>
    %c2_24 = arith.constant 2 : index
    %c0_25 = arith.constant 0 : index
    %c0_26 = arith.constant 0 : index
    %34 = vector.load %arg5[%c2_24, %c0_25, %c0_26] : memref<8x1x256xf32, #tpu.memory_space<vmem>>, vector<1x1x256xf32>
    %35 = vector.shape_cast %34 : vector<1x1x256xf32> to vector<1x256xf32>
    %36 = vector.broadcast %35 : vector<1x256xf32> to vector<2x256xf32>
    %37 = arith.addf %33, %36 : vector<2x256xf32>
    %cst_27 = arith.constant 0.000000e+00 : f32
    %38 = vector.broadcast %cst_27 : f32 to vector<2x256xf32>
    %39 = arith.maximumf %37, %38 : vector<2x256xf32>
    %c3 = arith.constant 3 : index
    %c0_28 = arith.constant 0 : index
    %c0_29 = arith.constant 0 : index
    %40 = vector.load %arg4[%c3, %c0_28, %c0_29] : memref<8x256x256xbf16, #tpu.memory_space<vmem>>, vector<1x256x256xbf16>
    %41 = vector.shape_cast %40 : vector<1x256x256xbf16> to vector<256x256xbf16>
    %42 = arith.truncf %39 : vector<2x256xf32> to vector<2x256xbf16>
    %cst_30 = arith.constant dense<0.000000e+00> : vector<2x256xf32>
    %43 = tpu.matmul %42, %41, %cst_30 {dimension_numbers = #tpu.dot_dimension_numbers<[1], [0], [0], [1], [0, 0, 1, 1], [], []>} : vector<2x256xbf16>, vector<256x256xbf16>, vector<2x256xf32> -> vector<2x256xf32>
    %c3_31 = arith.constant 3 : index
    %c0_32 = arith.constant 0 : index
    %c0_33 = arith.constant 0 : index
    %44 = vector.load %arg5[%c3_31, %c0_32, %c0_33] : memref<8x1x256xf32, #tpu.memory_space<vmem>>, vector<1x1x256xf32>
    %45 = vector.shape_cast %44 : vector<1x1x256xf32> to vector<1x256xf32>
    %46 = vector.broadcast %45 : vector<1x256xf32> to vector<2x256xf32>
    %47 = arith.addf %43, %46 : vector<2x256xf32>
    %cst_34 = arith.constant 0.000000e+00 : f32
    %48 = vector.broadcast %cst_34 : f32 to vector<2x256xf32>
    %49 = arith.maximumf %47, %48 : vector<2x256xf32>
    %50 = arith.addf %49, %39 : vector<2x256xf32>
    %c4 = arith.constant 4 : index
    %c0_35 = arith.constant 0 : index
    %c0_36 = arith.constant 0 : index
    %51 = vector.load %arg4[%c4, %c0_35, %c0_36] : memref<8x256x256xbf16, #tpu.memory_space<vmem>>, vector<1x256x256xbf16>
    %52 = vector.shape_cast %51 : vector<1x256x256xbf16> to vector<256x256xbf16>
    %53 = arith.truncf %50 : vector<2x256xf32> to vector<2x256xbf16>
    %cst_37 = arith.constant dense<0.000000e+00> : vector<2x256xf32>
    %54 = tpu.matmul %53, %52, %cst_37 {dimension_numbers = #tpu.dot_dimension_numbers<[1], [0], [0], [1], [0, 0, 1, 1], [], []>} : vector<2x256xbf16>, vector<256x256xbf16>, vector<2x256xf32> -> vector<2x256xf32>
    %c4_38 = arith.constant 4 : index
    %c0_39 = arith.constant 0 : index
    %c0_40 = arith.constant 0 : index
    %55 = vector.load %arg5[%c4_38, %c0_39, %c0_40] : memref<8x1x256xf32, #tpu.memory_space<vmem>>, vector<1x1x256xf32>
    %56 = vector.shape_cast %55 : vector<1x1x256xf32> to vector<1x256xf32>
    %57 = vector.broadcast %56 : vector<1x256xf32> to vector<2x256xf32>
    %58 = arith.addf %54, %57 : vector<2x256xf32>
    %cst_41 = arith.constant 0.000000e+00 : f32
    %59 = vector.broadcast %cst_41 : f32 to vector<2x256xf32>
    %60 = arith.maximumf %58, %59 : vector<2x256xf32>
    %c5 = arith.constant 5 : index
    %c0_42 = arith.constant 0 : index
    %c0_43 = arith.constant 0 : index
    %61 = vector.load %arg4[%c5, %c0_42, %c0_43] : memref<8x256x256xbf16, #tpu.memory_space<vmem>>, vector<1x256x256xbf16>
    %62 = vector.shape_cast %61 : vector<1x256x256xbf16> to vector<256x256xbf16>
    %63 = arith.truncf %60 : vector<2x256xf32> to vector<2x256xbf16>
    %cst_44 = arith.constant dense<0.000000e+00> : vector<2x256xf32>
    %64 = tpu.matmul %63, %62, %cst_44 {dimension_numbers = #tpu.dot_dimension_numbers<[1], [0], [0], [1], [0, 0, 1, 1], [], []>} : vector<2x256xbf16>, vector<256x256xbf16>, vector<2x256xf32> -> vector<2x256xf32>
    %c5_45 = arith.constant 5 : index
    %c0_46 = arith.constant 0 : index
    %c0_47 = arith.constant 0 : index
    %65 = vector.load %arg5[%c5_45, %c0_46, %c0_47] : memref<8x1x256xf32, #tpu.memory_space<vmem>>, vector<1x1x256xf32>
    %66 = vector.shape_cast %65 : vector<1x1x256xf32> to vector<1x256xf32>
    %67 = vector.broadcast %66 : vector<1x256xf32> to vector<2x256xf32>
    %68 = arith.addf %64, %67 : vector<2x256xf32>
    %cst_48 = arith.constant 0.000000e+00 : f32
    %69 = vector.broadcast %cst_48 : f32 to vector<2x256xf32>
    %70 = arith.maximumf %68, %69 : vector<2x256xf32>
    %71 = arith.addf %70, %60 : vector<2x256xf32>
    %c6 = arith.constant 6 : index
    %c0_49 = arith.constant 0 : index
    %c0_50 = arith.constant 0 : index
    %72 = vector.load %arg4[%c6, %c0_49, %c0_50] : memref<8x256x256xbf16, #tpu.memory_space<vmem>>, vector<1x256x256xbf16>
    %73 = vector.shape_cast %72 : vector<1x256x256xbf16> to vector<256x256xbf16>
    %74 = arith.truncf %71 : vector<2x256xf32> to vector<2x256xbf16>
    %cst_51 = arith.constant dense<0.000000e+00> : vector<2x256xf32>
    %75 = tpu.matmul %74, %73, %cst_51 {dimension_numbers = #tpu.dot_dimension_numbers<[1], [0], [0], [1], [0, 0, 1, 1], [], []>} : vector<2x256xbf16>, vector<256x256xbf16>, vector<2x256xf32> -> vector<2x256xf32>
    %c6_52 = arith.constant 6 : index
    %c0_53 = arith.constant 0 : index
    %c0_54 = arith.constant 0 : index
    %76 = vector.load %arg5[%c6_52, %c0_53, %c0_54] : memref<8x1x256xf32, #tpu.memory_space<vmem>>, vector<1x1x256xf32>
    %77 = vector.shape_cast %76 : vector<1x1x256xf32> to vector<1x256xf32>
    %78 = vector.broadcast %77 : vector<1x256xf32> to vector<2x256xf32>
    %79 = arith.addf %75, %78 : vector<2x256xf32>
    %cst_55 = arith.constant 0.000000e+00 : f32
    %80 = vector.broadcast %cst_55 : f32 to vector<2x256xf32>
    %81 = arith.maximumf %79, %80 : vector<2x256xf32>
    %c7 = arith.constant 7 : index
    %c0_56 = arith.constant 0 : index
    %c0_57 = arith.constant 0 : index
    %82 = vector.load %arg4[%c7, %c0_56, %c0_57] : memref<8x256x256xbf16, #tpu.memory_space<vmem>>, vector<1x256x256xbf16>
    %83 = vector.shape_cast %82 : vector<1x256x256xbf16> to vector<256x256xbf16>
    %84 = arith.truncf %81 : vector<2x256xf32> to vector<2x256xbf16>
    %cst_58 = arith.constant dense<0.000000e+00> : vector<2x256xf32>
    %85 = tpu.matmul %84, %83, %cst_58 {dimension_numbers = #tpu.dot_dimension_numbers<[1], [0], [0], [1], [0, 0, 1, 1], [], []>} : vector<2x256xbf16>, vector<256x256xbf16>, vector<2x256xf32> -> vector<2x256xf32>
    %c7_59 = arith.constant 7 : index
    %c0_60 = arith.constant 0 : index
    %c0_61 = arith.constant 0 : index
    %86 = vector.load %arg5[%c7_59, %c0_60, %c0_61] : memref<8x1x256xf32, #tpu.memory_space<vmem>>, vector<1x1x256xf32>
    %87 = vector.shape_cast %86 : vector<1x1x256xf32> to vector<1x256xf32>
    %88 = vector.broadcast %87 : vector<1x256xf32> to vector<2x256xf32>
    %89 = arith.addf %85, %88 : vector<2x256xf32>
    %cst_62 = arith.constant 0.000000e+00 : f32
    %90 = vector.broadcast %cst_62 : f32 to vector<2x256xf32>
    %91 = arith.maximumf %89, %90 : vector<2x256xf32>
    %c0_63 = arith.constant 0 : index
    %c0_64 = arith.constant 0 : index
    %92 = vector.load %arg6[%c0_63, %c0_64] : memref<256x256xbf16, #tpu.memory_space<vmem>>, vector<256x256xbf16>
    %93 = arith.truncf %91 : vector<2x256xf32> to vector<2x256xbf16>
    %cst_65 = arith.constant dense<0.000000e+00> : vector<2x256xf32>
    %94 = tpu.matmul %93, %92, %cst_65 {dimension_numbers = #tpu.dot_dimension_numbers<[1], [0], [0], [1], [0, 0, 1, 1], [], []>} : vector<2x256xbf16>, vector<256x256xbf16>, vector<2x256xf32> -> vector<2x256xf32>
    %c0_66 = arith.constant 0 : index
    %c0_67 = arith.constant 0 : index
    %95 = vector.load %arg7[%c0_66, %c0_67] : memref<1x256xf32, #tpu.memory_space<vmem>>, vector<1x256xf32>
    %96 = vector.broadcast %95 : vector<1x256xf32> to vector<2x256xf32>
    %97 = arith.addf %94, %96 : vector<2x256xf32>
    %c0_68 = arith.constant 0 : index
    %c0_69 = arith.constant 0 : index
    %98 = vector.load %arg8[%c0_68, %c0_69] : memref<2x256xf32, #tpu.memory_space<vmem>>, vector<2x256xf32>
    tpu.vector_store %arg8[%c0_68, %c0_69], %97 {strides = array<i32>} : memref<2x256xf32, #tpu.memory_space<vmem>>, vector<2x256xf32>,
    return
  }
  func.func @transform_0(%arg0: i32) -> (i32, i32) {
    %c0_i32 = arith.constant 0 : i32
    %c0_i32_0 = arith.constant 0 : i32
    return %arg0, %c0_i32 : i32, i32
  }
  func.func @transform_1(%arg0: i32) -> (i32, i32) {
    %c0_i32 = arith.constant 0 : i32
    %c0_i32_0 = arith.constant 0 : i32
    %c0_i32_1 = arith.constant 0 : i32
    return %c0_i32, %c0_i32_0 : i32, i32
  }
  func.func @transform_2(%arg0: i32) -> (i32, i32) {
    %c0_i32 = arith.constant 0 : i32
    %c0_i32_0 = arith.constant 0 : i32
    %c0_i32_1 = arith.constant 0 : i32
    return %c0_i32, %c0_i32_0 : i32, i32
  }
  func.func @transform_3(%arg0: i32) -> (i32, i32, i32) {
    %c0_i32 = arith.constant 0 : i32
    %c0_i32_0 = arith.constant 0 : i32
    %c0_i32_1 = arith.constant 0 : i32
    %c0_i32_2 = arith.constant 0 : i32
    return %c0_i32, %c0_i32_0, %c0_i32_1 : i32, i32, i32
  }
  func.func @transform_4(%arg0: i32) -> (i32, i32, i32) {
    %c0_i32 = arith.constant 0 : i32
    %c0_i32_0 = arith.constant 0 : i32
    %c0_i32_1 = arith.constant 0 : i32
    %c0_i32_2 = arith.constant 0 : i32
    return %c0_i32, %c0_i32_0, %c0_i32_1 : i32, i32, i32
  }
  func.func @transform_5(%arg0: i32) -> (i32, i32) {
    %c0_i32 = arith.constant 0 : i32
    %c0_i32_0 = arith.constant 0 : i32
    %c0_i32_1 = arith.constant 0 : i32
    return %c0_i32, %c0_i32_0 : i32, i32
  }
  func.func @transform_6(%arg0: i32) -> (i32, i32) {
    %c0_i32 = arith.constant 0 : i32
    %c0_i32_0 = arith.constant 0 : i32
    %c0_i32_1 = arith.constant 0 : i32
    return %c0_i32, %c0_i32_0 : i32, i32
  }
  func.func @transform_7(%arg0: i32) -> (i32, i32) {
    %c0_i32 = arith.constant 0 : i32
    %c0_i32_0 = arith.constant 0 : i32
    return %arg0, %c0_i32 : i32, i32
  }
}

</mosaic_0001>

<bundles_post_ra>
// kernel: tpu_custom_call.1
= control target key start
LH: loop header
LB: loop body
LE: loop exit
PB: predicated region body
PF: predicated region fallthrough
CT: control target
= control target key end

     0   :  { %12 = vsyncpa [#allocation3], 0  ;;  %s4005_s0 = inlined_call_operand.hbm [shape: f32[2,384], index: 0, kind: input, shape index: {}]   ;;  %s4006_s1 = inlined_call_operand.hbm [shape: bf16[384,256], index: 1, kind: input, shape index: {}]   ;;  %s4007_s2 = inlined_call_operand.vmem [shape: f32[1,256], index: 2, kind: input, shape index: {}]   ;;  %s4008_s3 = inlined_call_operand.hbm [shape: bf16[8,256,256], index: 3, kind: input, shape index: {}]   ;;  %s4009_s4 = inlined_call_operand.hbm [shape: f32[8,1,256], index: 4, kind: input, shape index: {}]   ;;  %s4010_s5 = inlined_call_operand.hbm [shape: bf16[256,256], index: 5, kind: input, shape index: {}]   ;;  %s4011_s6 = inlined_call_operand.vmem [shape: f32[1,256], index: 6, kind: input, shape index: {}]   ;;  %s4012_s7 = inlined_call_operand.hbm [shape: f32[2,256], index: 7, kind: output, shape index: {}]  }
   0x1   :  { %13 = vsyncpa [#allocation6], 0 }
   0x2   :  { %14 = vsyncpa [#allocation9], 0 }
   0x3   :  { %15 = vsyncpa [#allocation4], 0  ;;  %s3790_s24 = smov [#allocation5]   ;;  %s3650_s28 = scalar_lea.hbm %s4006_s1, 6144 }
   0x4   :  { %s31_s25 = sshll.u32 %s3790_s24, 4  ;;  %p3651_p0 = scmp.ne.s32.totalorder %s4006_s1, %s3650_s28  ;;  %s32_s25 = int_to_ptr.vmem [resolvable:$true] %s31_s25 }
   0x5   :  { %p3654_p1 = scmp.lt.u32.totalorder %s3650_s28, %s4006_s1 }
   0x7   :  { %p3656_p2 = pnand %p3654_p1, %p3651_p0 }
   0x9   :  { %3659 = shalt.err (!%p3656_p2)
}
   0xa   :  { %s3660_s10 = scalar_lea.vmem %s32_s25, 6144  ;;  %p3665_p4 = scmp.lt.s32.totalorder %s32_s25, %s32_s25 }
   0xb   :  { %p3661_p3 = scmp.ne.s32.totalorder %s32_s25, %s3660_s10  ;;  %p3666_p5 = scmp.lt.s32.totalorder %s3660_s10, %s3660_s10 }
   0xd   :  { %p3667_p6 = por %p3666_p5, %p3665_p4 }
   0xf   :  { %p3668_p7 = pnand %p3667_p6, %p3661_p3 }
  0x11   :  { %3671 = shalt.err (!%p3668_p7)
}
  0x12   :  { %s3791_s11 = smov 128   ;;  %s3792_s12 = smov 8  }
  0x13   :  { %37 = dma.hbm_to_vmem [thread:$0]  %s4006_s1, 6144, %s32_s25, [#allocation6], %s3791_s11, %s3791_s11, %s3792_s12  }
  0x14   :  { %s3793_s15 = smov [#allocation8]   ;;  %s3672_s19 = scalar_lea.hbm %s4009_s4, 256 }
  0x15   :  { %s57_s16 = sshll.u32 %s3793_s15, 4  ;;  %p3673_p8 = scmp.ne.s32.totalorder %s4009_s4, %s3672_s19  ;;  %s58_s16 = int_to_ptr.vmem [resolvable:$true] %s57_s16 }
  0x16   :  { %p3676_p9 = scmp.lt.u32.totalorder %s3672_s19, %s4009_s4 }
  0x18   :  { %p3678_p10 = pnand %p3676_p9, %p3673_p8 }
  0x1a   :  { %3681 = shalt.err (!%p3678_p10)
}
  0x1b   :  { %s3682_s24 = scalar_lea.vmem %s58_s16, 256  ;;  %p3687_p12 = scmp.lt.s32.totalorder %s58_s16, %s58_s16 }
  0x1c   :  { %p3683_p11 = scmp.ne.s32.totalorder %s58_s16, %s3682_s24  ;;  %p3688_p13 = scmp.lt.s32.totalorder %s3682_s24, %s3682_s24 }
  0x1e   :  { %p3689_p0 = por %p3688_p13, %p3687_p12 }
  0x20   :  { %p3690_p1 = pnand %p3689_p0, %p3683_p11 }
  0x22   :  { %3693 = shalt.err (!%p3690_p1)
}
  0x23   :  { %s3794_s1 = smov 32   ;;  %s3795_s25 = smov 2  }
  0x24   :  { %63 = dma.hbm_to_vmem [thread:$0]  %s4009_s4, 256, %s58_s16, [#allocation9], %s3794_s1, %s3794_s1, %s3795_s25  }
  0x25   :  { %s3796_s28 = smov [#allocation2]   ;;  %s3797_s30 = smov [#allocation7]  }
  0x26   :  { %s22_s29 = sshll.u32 %s3796_s28, 4  ;;  %s45_s8 = sshll.u32 %s3797_s30, 4  ;;  %s23_s29 = int_to_ptr.vmem [resolvable:$true] %s22_s29  ;;  %s3869_s8 = int_to_ptr.vmem [resolvable:$true] %s45_s8 }
  0x27   :  { %s3694_s13 = scalar_lea.hbm %s4005_s0, 96 }
  0x28   :  { %p3695_p2 = scmp.ne.s32.totalorder %s4005_s0, %s3694_s13  ;;  %p3698_p3 = scmp.lt.u32.totalorder %s3694_s13, %s4005_s0 }
  0x2a   :  { %p3700_p4 = pnand %p3698_p3, %p3695_p2 }
  0x2c   :  { %3703 = shalt.err (!%p3700_p4)
}
  0x2d   :  { %s3704_s4 = scalar_lea.vmem %s23_s29, 96  ;;  %p3709_p6 = scmp.lt.s32.totalorder %s23_s29, %s23_s29 }
  0x2e   :  { %p3705_p5 = scmp.ne.s32.totalorder %s23_s29, %s3704_s4  ;;  %p3710_p7 = scmp.lt.s32.totalorder %s3704_s4, %s3704_s4 }
  0x30   :  { %p3711_p8 = por %p3710_p7, %p3709_p6 }
  0x32   :  { %p3712_p9 = pnand %p3711_p8, %p3705_p5 }
  0x34   :  { %3715 = shalt.err (!%p3712_p9)
}
  0x35   :  { %25 = dma.hbm_to_vmem [thread:$0]  %s4005_s0, 96, %s23_s29, [#allocation3]  }
  0x36   :  { %s3716_s22 = scalar_lea.hbm %s4008_s3, 32768 }
  0x37   :  { %p3717_p10 = scmp.ne.s32.totalorder %s4008_s3, %s3716_s22  ;;  %p3720_p11 = scmp.lt.u32.totalorder %s3716_s22, %s4008_s3 }
  0x39   :  { %p3722_p12 = pnand %p3720_p11, %p3717_p10 }
  0x3b   :  { %3725 = shalt.err (!%p3722_p12)
}
  0x3c   :  { %s3726_s26 = scalar_lea.vmem %s3869_s8, 32768  ;;  %p3731_p0 = scmp.lt.s32.totalorder %s3869_s8, %s3869_s8 }
  0x3d   :  { %p3727_p13 = scmp.ne.s32.totalorder %s3869_s8, %s3726_s26  ;;  %p3732_p1 = scmp.lt.s32.totalorder %s3726_s26, %s3726_s26 }
  0x3f   :  { %p3733_p2 = por %p3732_p1, %p3731_p0 }
  0x41   :  { %p3734_p3 = pnand %p3733_p2, %p3727_p13 }
  0x43   :  { %3737 = shalt.err (!%p3734_p3)
}
  0x44   :  { %51 = dma.hbm_to_vmem [thread:$0]  %s4008_s3, 32768, %s3869_s8, [#allocation6], %s3791_s11, %s3791_s11, %s3792_s12  }
  0x45   :  { %s3798_s28 = smov [#allocation10]   ;;  %s3738_s10 = scalar_lea.hbm %s4010_s5, 4096 }
  0x46   :  { %s69_s29 = sshll.u32 %s3798_s28, 4  ;;  %p3739_p4 = scmp.ne.s32.totalorder %s4010_s5, %s3738_s10  ;;  %s70_s29 = int_to_ptr.vmem [resolvable:$true] %s69_s29 }
  0x47   :  { %p3742_p5 = scmp.lt.u32.totalorder %s3738_s10, %s4010_s5 }
  0x49   :  { %p3744_p6 = pnand %p3742_p5, %p3739_p4 }
  0x4b   :  { %3747 = shalt.err (!%p3744_p6)
}
  0x4c   :  { %s3748_s18 = scalar_lea.vmem %s70_s29, 4096  ;;  %p3753_p8 = scmp.lt.s32.totalorder %s70_s29, %s70_s29 }
  0x4d   :  { %p3749_p7 = scmp.ne.s32.totalorder %s70_s29, %s3748_s18  ;;  %p3754_p9 = scmp.lt.s32.totalorder %s3748_s18, %s3748_s18 }
  0x4f   :  { %p3755_p10 = por %p3754_p9, %p3753_p8 }
  0x51   :  { %p3756_p11 = pnand %p3755_p10, %p3749_p7 }
  0x53   :  { %3759 = shalt.err (!%p3756_p11)
}
  0x54   :  { %75 = dma.hbm_to_vmem [thread:$0]  %s4010_s5, 4096, %s70_s29, [#allocation9], %s3791_s11, %s3791_s11, %s3792_s12  }
  0x55   :  { %3782 = dma.done.wait [#allocation3], 96  }
  0x56   :  { %3783 = vsyncadd [#allocation3], 4294967200 }
  0x57   :  { %3784 = dma.done.wait [#allocation6], 38912  }
  0x58   :  { %3785 = vsyncadd [#allocation6], 4294928384 }
  0x59   :  { %3786 = dma.done.wait [#allocation9], 4352  }
  0x5a   :  { %3787 = vsyncadd [#allocation9], 4294962944  ;;  %v3145_v0 = vld [vmem:[#allocation5 + $0x4] ss:$8 sps:$4 sm:$0xff]   ;;  %v3147_v1 = vld [vmem:[#allocation5] ss:$8 sps:$4 sm:$0xff]   ;;  %v148_v9 = vlaneseq }
  0x5b   :  { %418 = vmatprep.subr.bf16.mxu0 %v3145_v0  ;;  %v3148_v2 = vld [vmem:[#allocation5 + $0x14] ss:$8 sps:$4 sm:$0xff]   ;;  %v3150_v3 = vld [vmem:[#allocation5 + $0x10] ss:$8 sps:$4 sm:$0xff]   ;;  %v3151_v4 = vld [vmem:[#allocation5 + $0x24] ss:$8 sps:$4 sm:$0xff]  }
  0x5c   :  { %419 = vmatpush1.bf16.msra.mxu0 %v3147_v1  ;;  %v3153_v5 = vld [vmem:[#allocation5 + $0x20] ss:$8 sps:$4 sm:$0xff]   ;;  %v3154_v6 = vld [vmem:[#allocation5 + $0x34] ss:$8 sps:$4 sm:$0xff]   ;;  %v3799_v7 = vmov 1983009808  }
  0x5d   :  { %420 = vmatprep.subr.bf16.mxu0 %v3148_v2  ;;  %v146_v8 = vunpack.c.l.s4 %v3799_v7  ;;  %v3156_v10 = vld [vmem:[#allocation5 + $0x30] ss:$8 sps:$4 sm:$0xff]   ;;  %v3157_v11 = vld [vmem:[#allocation5 + $0x44] ss:$8 sps:$4 sm:$0xff]   ;;  %v3918_v13 = vshrl.u32 %v148_v9, 7  ;;  %s3801_s4 = smov [#allocation11]  }
  0x5e   :  { %v3159_v14 = vld [vmem:[#allocation5 + $0x40] ss:$8 sps:$4 sm:$0xff]   ;;  %v3160_v15 = vld [vmem:[#allocation5 + $0x54] ss:$8 sps:$4 sm:$0xff]   ;;  %v3162_v17 = vld [vmem:[#allocation5 + $0x50] ss:$8 sps:$4 sm:$0xff]  }
  0x5f   :  { %v147_v12 = vunpack.c.0.s8 %v146_v8  ;;  %v3163_v18 = vld [vmem:[#allocation5 + $0x64] ss:$8 sps:$4 sm:$0xff]   ;;  %v94_v19 = vld [vmem:[#allocation2] sm:$0x3f]  ;;  %v3165_v22 = vld [vmem:[#allocation5 + $0x60] ss:$8 sps:$4 sm:$0xff]  }
  0x60   :  { %421 = vmatpush1.bf16.msra.mxu0 %v3150_v3  ;;  %v144_v20 = vcombine.high %v94_v19, %v94_v19  ;;  %v3166_v23 = vld [vmem:[#allocation5 + $0x74] ss:$8 sps:$4 sm:$0xff]   ;;  %v3168_v27 = vld [vmem:[#allocation5 + $0x70] ss:$8 sps:$4 sm:$0xff]   ;;  %v3169_v28 = vld [vmem:[#allocation5 + $0x84] ss:$8 sps:$4 sm:$0xff]  }
  0x61   :  { %422 = vmatprep.subr.bf16.mxu0 %v3151_v4  ;;  %v150_v16 = vsub.s32 %v147_v12, %v3918_v13  ;;  %v3171_v29 = vld [vmem:[#allocation5 + $0x80] ss:$8 sps:$4 sm:$0xff]   ;;  %v3172_v30 = vld [vmem:[#allocation5 + $0x94] ss:$8 sps:$4 sm:$0xff]   ;;  %v3218_v31 = vld [vmem:[#allocation7 + $0x4] ss:$8 sps:$4 sm:$0xff]  }
  0x62   :  { %v3220_v32 = vld [vmem:[#allocation7] ss:$8 sps:$4 sm:$0xff]   ;;  %v3174_v33 = vld [vmem:[#allocation5 + $0x90] ss:$8 sps:$4 sm:$0xff]   ;;  %v3221_v34 = vld [vmem:[#allocation7 + $0x14] ss:$8 sps:$4 sm:$0xff]   ;;  %708 = vmatprep.subr.bf16.mxu1 %v3218_v31 }
  0x63   :  { %v3921_v21 = vrot.slane %v94_v19, %v150_v16  ;;  %v3923_v24 = vrot.slane %v144_v20, %v150_v16  ;;  %v3175_v35 = vld [vmem:[#allocation5 + $0xa4] ss:$8 sps:$4 sm:$0xff]   ;;  %709 = vmatpush1.bf16.msra.mxu1 %v3220_v32  ;;  %v3223_v36 = vld [vmem:[#allocation7 + $0x10] ss:$8 sps:$4 sm:$0xff]   ;;  %v3177_v38 = vld [vmem:[#allocation5 + $0xa0] ss:$8 sps:$4 sm:$0xff]  }
  0x64   :  { %423 = vmatpush1.bf16.msra.mxu0 %v3153_v5  ;;  %710 = vmatprep.subr.bf16.mxu1 %v3221_v34  ;;  %v3224_v37 = vld [vmem:[#allocation7 + $0x24] ss:$8 sps:$4 sm:$0xff]   ;;  %v3178_v39 = vld [vmem:[#allocation5 + $0xb4] ss:$8 sps:$4 sm:$0xff]   ;;  %v3226_v40 = vld [vmem:[#allocation7 + $0x20] ss:$8 sps:$4 sm:$0xff]  }
  0x65   :  { %424 = vmatprep.subr.bf16.mxu0 %v3154_v6  ;;  %v159_v25 = vcombine.high %v3921_v21, %v3921_v21  ;;  %v3227_v41 = vld [vmem:[#allocation7 + $0x34] ss:$8 sps:$4 sm:$0xff]   ;;  %v3180_v42 = vld [vmem:[#allocation5 + $0xb0] ss:$8 sps:$4 sm:$0xff]   ;;  %v3181_v43 = vld [vmem:[#allocation5 + $0xc4] ss:$8 sps:$4 sm:$0xff]   ;;  %v163_v63 = vpack.c.bf16 %v3921_v21, %v3921_v21 }
  0x66   :  { %v3229_v44 = vld [vmem:[#allocation7 + $0x30] ss:$8 sps:$4 sm:$0xff]   ;;  %v3230_v45 = vld [vmem:[#allocation7 + $0x44] ss:$8 sps:$4 sm:$0xff]   ;;  %v3183_v46 = vld [vmem:[#allocation5 + $0xc0] ss:$8 sps:$4 sm:$0xff]  }
  0x67   :  { %v164_v26 = vpack.c.bf16 %v159_v25, %v159_v25  ;;  %711 = vmatpush1.bf16.msra.mxu1 %v3223_v36  ;;  %v3184_v47 = vld [vmem:[#allocation5 + $0xd4] ss:$8 sps:$4 sm:$0xff]   ;;  %v3232_v48 = vld [vmem:[#allocation7 + $0x40] ss:$8 sps:$4 sm:$0xff]   ;;  %v3186_v49 = vld [vmem:[#allocation5 + $0xd0] ss:$8 sps:$4 sm:$0xff]  }
  0x68   :  { %425 = vmatpush1.bf16.msra.mxu0 %v3156_v10  ;;  %712 = vmatprep.subr.bf16.mxu1 %v3224_v37  ;;  %v3233_v50 = vld [vmem:[#allocation7 + $0x54] ss:$8 sps:$4 sm:$0xff]   ;;  %v3187_v51 = vld [vmem:[#allocation5 + $0xe4] ss:$8 sps:$4 sm:$0xff]   ;;  %v3235_v52 = vld [vmem:[#allocation7 + $0x50] ss:$8 sps:$4 sm:$0xff]  }
  0x69   :  { %426 = vmatprep.subr.bf16.mxu0 %v3157_v11  ;;  %450 = vmatprep.mubr.bf16.mxu0 %v164_v26  ;;  %v3236_v53 = vld [vmem:[#allocation7 + $0x64] ss:$8 sps:$4 sm:$0xff]   ;;  %v3189_v54 = vld [vmem:[#allocation5 + $0xe0] ss:$8 sps:$4 sm:$0xff]   ;;  %v3190_v55 = vld [vmem:[#allocation5 + $0xf4] ss:$8 sps:$4 sm:$0xff]  }
  0x6a   :  { %v3238_v56 = vld [vmem:[#allocation7 + $0x60] ss:$8 sps:$4 sm:$0xff]   ;;  %v3239_v57 = vld [vmem:[#allocation7 + $0x74] ss:$8 sps:$4 sm:$0xff]   ;;  %v3192_v58 = vld [vmem:[#allocation5 + $0xf0] ss:$8 sps:$4 sm:$0xff]  }
  0x6b   :  { %713 = vmatpush1.bf16.msra.mxu1 %v3226_v40  ;;  %v3196_v59 = vld [vmem:[#allocation5 + $0x104] ss:$8 sps:$4 sm:$0xff]   ;;  %v3241_v60 = vld [vmem:[#allocation7 + $0x70] ss:$8 sps:$4 sm:$0xff]   ;;  %v3194_v62 = vld [vmem:[#allocation5 + $0x100] ss:$8 sps:$4 sm:$0xff]  }
  0x6c   :  { %427 = vmatpush1.bf16.msra.mxu0 %v3159_v14  ;;  %714 = vmatprep.subr.bf16.mxu1 %v3227_v41  ;;  %v3242_v61 = vld [vmem:[#allocation7 + $0x84] ss:$8 sps:$4 sm:$0xff]   ;;  %v3199_v0 = vld [vmem:[#allocation5 + $0x114] ss:$8 sps:$4 sm:$0xff]   ;;  %v3244_v1 = vld [vmem:[#allocation7 + $0x80] ss:$8 sps:$4 sm:$0xff]  }
  0x6d   :  { %428 = vmatprep.subr.bf16.mxu0 %v3160_v15  ;;  %v3245_v2 = vld [vmem:[#allocation7 + $0x94] ss:$8 sps:$4 sm:$0xff]   ;;  %v3197_v3 = vld [vmem:[#allocation5 + $0x110] ss:$8 sps:$4 sm:$0xff]   ;;  %v3202_v4 = vld [vmem:[#allocation5 + $0x124] ss:$8 sps:$4 sm:$0xff]  }
  0x6e   :  { %v3247_v5 = vld [vmem:[#allocation7 + $0x90] ss:$8 sps:$4 sm:$0xff]   ;;  %v3800_v6 = vmov 0   ;;  %v3248_v7 = vld [vmem:[#allocation7 + $0xa4] ss:$8 sps:$4 sm:$0xff]   ;;  %v3932_v34 = vsub.s32 0, %v3918_v13 }
  0x6f   :  { %715 = vmatpush1.bf16.msra.mxu1 %v3229_v44  ;;  %v3200_v8 = vld [vmem:[#allocation5 + $0x120] ss:$8 sps:$4 sm:$0xff]   ;;  %v3205_v9 = vld [vmem:[#allocation5 + $0x134] ss:$8 sps:$4 sm:$0xff]   ;;  %v3203_v12 = vld [vmem:[#allocation5 + $0x130] ss:$8 sps:$4 sm:$0xff]  }
  0x70   :  { %429 = vmatpush1.bf16.msra.mxu0 %v3162_v17  ;;  %716 = vmatprep.subr.bf16.mxu1 %v3230_v45  ;;  %v3250_v10 = vld [vmem:[#allocation7 + $0xa0] ss:$8 sps:$4 sm:$0xff]   ;;  %v3251_v11 = vld [vmem:[#allocation7 + $0xb4] ss:$8 sps:$4 sm:$0xff]   ;;  %v3208_v14 = vld [vmem:[#allocation5 + $0x144] ss:$8 sps:$4 sm:$0xff]  }
  0x71   :  { %430 = vmatprep.subr.bf16.mxu0 %v3163_v18  ;;  %v3253_v15 = vld [vmem:[#allocation7 + $0xb0] ss:$8 sps:$4 sm:$0xff]   ;;  %v3254_v16 = vld [vmem:[#allocation7 + $0xc4] ss:$8 sps:$4 sm:$0xff]   ;;  %v3206_v17 = vld [vmem:[#allocation5 + $0x140] ss:$8 sps:$4 sm:$0xff]  }
  0x72   :  { %v3211_v18 = vld [vmem:[#allocation5 + $0x154] ss:$8 sps:$4 sm:$0xff]   ;;  %v3256_v19 = vld [vmem:[#allocation7 + $0xc0] ss:$8 sps:$4 sm:$0xff]   ;;  %v3209_v21 = vld [vmem:[#allocation5 + $0x150] ss:$8 sps:$4 sm:$0xff]  }
  0x73   :  { %717 = vmatpush1.bf16.msra.mxu1 %v3232_v48  ;;  %v3257_v20 = vld [vmem:[#allocation7 + $0xd4] ss:$8 sps:$4 sm:$0xff]   ;;  %v3212_v25 = vld [vmem:[#allocation5 + $0x160] ss:$8 sps:$4 sm:$0xff]   ;;  %v3265_v32 = vld [vmem:[#allocation7 + $0xf0] ss:$8 sps:$4 sm:$0xff]  }
  0x74   :  { %431 = vmatpush1.bf16.msra.mxu0 %v3165_v22  ;;  %718 = vmatprep.subr.bf16.mxu1 %v3233_v50  ;;  %v3214_v22 = vld [vmem:[#allocation5 + $0x164] ss:$8 sps:$4 sm:$0xff]   ;;  %v3217_v26 = vld [vmem:[#allocation5 + $0x174] ss:$8 sps:$4 sm:$0xff]   ;;  %s2779_s16 = sshll.u32 %s3801_s4, 4  ;;  %s2780_s16 = int_to_ptr.vmem [resolvable:$true] %s2779_s16 }
  0x75   :  { %432 = vmatprep.subr.bf16.mxu0 %v3166_v23  ;;  %v3259_v23 = vld [vmem:[#allocation7 + $0xd0] ss:$8 sps:$4 sm:$0xff]   ;;  %v3263_v31 = vld [vmem:[#allocation7 + $0xf4] ss:$8 sps:$4 sm:$0xff]   ;;  %v3274_v50 = vld [vmem:[#allocation7 + $0x124] ss:$8 sps:$4 sm:$0xff]   ;;  %p3765_p13 = scmp.lt.s32.totalorder %s2780_s16, %s2780_s16 }
  0x76   :  { %v3271_v48 = vld [vmem:[#allocation7 + $0x114] ss:$8 sps:$4 sm:$0xff]   ;;  %s3760_s19 = scalar_lea.vmem %s2780_s16, 64 }
  0x77   :  { %719 = vmatpush1.bf16.msra.mxu1 %v3235_v52  ;;  %v3277_v52 = vld [vmem:[#allocation7 + $0x134] ss:$8 sps:$4 sm:$0xff]   ;;  %p3761_p12 = scmp.ne.s32.totalorder %s2780_s16, %s3760_s19  ;;  %p3766_p0 = scmp.lt.s32.totalorder %s3760_s19, %s3760_s19 }
  0x78   :  { %433 = vmatpush1.bf16.msra.mxu0 %v3168_v27  ;;  %720 = vmatprep.subr.bf16.mxu1 %v3236_v53  ;;  %v3215_v27 = vld [vmem:[#allocation5 + $0x170] ss:$8 sps:$4 sm:$0xff]  }
  0x79   :  { %434 = vmatprep.subr.bf16.mxu0 %v3169_v28  ;;  %v165_v28 = vpack.c.bf16 %v3923_v24, %v3923_v24  ;;  %v166_v24 = vld [vmem:[%s4007_s2] sm:$0x3]  ;;  %p3767_p1 = por %p3766_p0, %p3765_p13 }
  0x7a   :  { %v171_v36 = vrot.slane %v166_v24, %v3932_v34  ;;  %v3275_v53 = vld [vmem:[#allocation7 + $0x130] ss:$8 sps:$4 sm:$0xff]  }
  0x7b   :  { %721 = vmatpush1.bf16.msra.mxu1 %v3238_v56  ;;  %v3283_v56 = vld [vmem:[#allocation7 + $0x154] ss:$8 sps:$4 sm:$0xff]   ;;  %p3768_p2 = pnand %p3767_p1, %p3761_p12 }
  0x7c   :  { %435 = vmatpush1.bf16.msra.mxu0 %v3171_v29  ;;  %722 = vmatprep.subr.bf16.mxu1 %v3239_v57  ;;  %v3260_v29 = vld [vmem:[#allocation7 + $0xe4] ss:$8 sps:$4 sm:$0xff]   ;;  %v3281_v57 = vld [vmem:[#allocation7 + $0x150] ss:$8 sps:$4 sm:$0xff]  }
  0x7d   :  { %436 = vmatprep.subr.bf16.mxu0 %v3172_v30  ;;  %v3262_v30 = vld [vmem:[#allocation7 + $0xe0] ss:$8 sps:$4 sm:$0xff]  }
  0x7f   :  { %723 = vmatpush1.bf16.msra.mxu1 %v3241_v60  ;;  %v3289_v60 = vld [vmem:[#allocation7 + $0x174] ss:$8 sps:$4 sm:$0xff]  }
  0x80   :  { %437 = vmatpush1.bf16.msra.mxu0 %v3174_v33  ;;  %724 = vmatprep.subr.bf16.mxu1 %v3242_v61  ;;  %v3268_v33 = vld [vmem:[#allocation7 + $0x104] ss:$8 sps:$4 sm:$0xff]   ;;  %v3287_v61 = vld [vmem:[#allocation7 + $0x170] ss:$8 sps:$4 sm:$0xff]  }
  0x81   :  { %438 = vmatprep.subr.bf16.mxu0 %v3175_v35  ;;  %v3935_v35 = vsub.s32 1, %v3918_v13 }
  0x83   :  { %725 = vmatpush1.bf16.msra.mxu1 %v3244_v1  ;;  %v175_v37 = vrot.slane %v166_v24, %v3935_v35  ;;  %v3293_v1 = vld [vmem:[#allocation7 + $0x190] ss:$8 sps:$4 sm:$0xff]   ;;  %v3343_v24 = vld [vmem:[#allocation7 + $0x294] ss:$8 sps:$4 sm:$0xff]  }
  0x84   :  { %439 = vmatpush1.bf16.msra.mxu0 %v3177_v38  ;;  %726 = vmatprep.subr.bf16.mxu1 %v3245_v2  ;;  %v3298_v2 = vld [vmem:[#allocation7 + $0x1a4] ss:$8 sps:$4 sm:$0xff]  }
  0x85   :  { %440 = vmatprep.subr.bf16.mxu0 %v3178_v39 }
  0x87   :  { %727 = vmatpush1.bf16.msra.mxu1 %v3247_v5  ;;  %v3299_v5 = vld [vmem:[#allocation7 + $0x1b0] ss:$8 sps:$4 sm:$0xff]  }
  0x88   :  { %441 = vmatpush1.bf16.msra.mxu0 %v3180_v42  ;;  %728 = vmatprep.subr.bf16.mxu1 %v3248_v7  ;;  %v3302_v7 = vld [vmem:[#allocation7 + $0x1c0] ss:$8 sps:$4 sm:$0xff]  }
  0x89   :  { %442 = vmatprep.subr.bf16.mxu0 %v3181_v43 }
  0x8b   :  { %729 = vmatpush1.bf16.msra.mxu1 %v3250_v10  ;;  %v3310_v10 = vld [vmem:[#allocation7 + $0x1e4] ss:$8 sps:$4 sm:$0xff]  }
  0x8c   :  { %443 = vmatpush1.bf16.msra.mxu0 %v3183_v46  ;;  %730 = vmatprep.subr.bf16.mxu1 %v3251_v11  ;;  %v3266_v46 = vld [vmem:[#allocation7 + $0x100] ss:$8 sps:$4 sm:$0xff]  }
  0x8d   :  { %444 = vmatprep.subr.bf16.mxu0 %v3184_v47  ;;  %v3308_v11 = vld [vmem:[#allocation7 + $0x1e0] ss:$8 sps:$4 sm:$0xff]  }
  0x8f   :  { %731 = vmatpush1.bf16.msra.mxu1 %v3253_v15  ;;  %v3314_v15 = vld [vmem:[#allocation7 + $0x200] ss:$8 sps:$4 sm:$0xff]  }
  0x90   :  { %445 = vmatpush1.bf16.msra.mxu0 %v3186_v49  ;;  %732 = vmatprep.subr.bf16.mxu1 %v3254_v16  ;;  %v3269_v49 = vld [vmem:[#allocation7 + $0x110] ss:$8 sps:$4 sm:$0xff]   ;;  %v3316_v16 = vld [vmem:[#allocation7 + $0x204] ss:$8 sps:$4 sm:$0xff]  }
  0x91   :  { %446 = vmatprep.subr.bf16.mxu0 %v3187_v51  ;;  %v3272_v51 = vld [vmem:[#allocation7 + $0x120] ss:$8 sps:$4 sm:$0xff]  }
  0x93   :  { %733 = vmatpush1.bf16.msra.mxu1 %v3256_v19  ;;  %v3322_v19 = vld [vmem:[#allocation7 + $0x224] ss:$8 sps:$4 sm:$0xff]  }
  0x94   :  { %447 = vmatpush1.bf16.msra.mxu0 %v3189_v54  ;;  %734 = vmatprep.subr.bf16.mxu1 %v3257_v20  ;;  %v3280_v54 = vld [vmem:[#allocation7 + $0x144] ss:$8 sps:$4 sm:$0xff]   ;;  %v3320_v20 = vld [vmem:[#allocation7 + $0x220] ss:$8 sps:$4 sm:$0xff]  }
  0x95   :  { %448 = vmatprep.subr.bf16.mxu0 %v3190_v55  ;;  %v3278_v55 = vld [vmem:[#allocation7 + $0x140] ss:$8 sps:$4 sm:$0xff]  }
  0x97   :  { %735 = vmatpush1.bf16.msra.mxu1 %v3259_v23  ;;  %v3328_v23 = vld [vmem:[#allocation7 + $0x244] ss:$8 sps:$4 sm:$0xff]  }
  0x98   :  { %449 = vmatpush1.bf16.msra.mxu0 %v3192_v58  ;;  %736 = vmatprep.subr.bf16.mxu1 %v3260_v29  ;;  %v3286_v58 = vld [vmem:[#allocation7 + $0x164] ss:$8 sps:$4 sm:$0xff]   ;;  %v3332_v29 = vld [vmem:[#allocation7 + $0x260] ss:$8 sps:$4 sm:$0xff]  }
  0x99   :  { %459 = vmatprep.subr.bf16.mxu0 %v3196_v59  ;;  %v3284_v59 = vld [vmem:[#allocation7 + $0x160] ss:$8 sps:$4 sm:$0xff]  }
  0x9b   :  { %451 = vmatmul.mubr.bf16.vlgmr.msra.gmra.mrb[0].mxu0 %v163_v63  ;;  %737 = vmatpush1.bf16.msra.mxu1 %v3262_v30  ;;  %v3290_v63 = vld [vmem:[#allocation7 + $0x180] ss:$8 sps:$4 sm:$0xff]   ;;  %v3337_v30 = vld [vmem:[#allocation7 + $0x274] ss:$8 sps:$4 sm:$0xff]  }
  0x9c   :  { %460 = vmatpush1.bf16.msra.mxu0 %v3194_v62  ;;  %491 = vmatprep.mubr.bf16.mxu0 %v3800_v6  ;;  %v3292_v62 = vld [vmem:[#allocation7 + $0x184] ss:$8 sps:$4 sm:$0xff]  }
  0x9d   :  { %461 = vmatprep.subr.bf16.mxu0 %v3199_v0  ;;  %738 = vmatprep.subr.bf16.mxu1 %v3263_v31  ;;  %v3295_v0 = vld [vmem:[#allocation7 + $0x194] ss:$8 sps:$4 sm:$0xff]   ;;  %v3304_v6 = vld [vmem:[#allocation7 + $0x1c4] ss:$8 sps:$4 sm:$0xff]   ;;  %v3335_v31 = vld [vmem:[#allocation7 + $0x270] ss:$8 sps:$4 sm:$0xff]  }
  0x9f   :  { %739 = vmatpush1.bf16.msra.mxu1 %v3265_v32  ;;  %v3340_v32 = vld [vmem:[#allocation7 + $0x284] ss:$8 sps:$4 sm:$0xff]  }
  0xa0   :  { %462 = vmatpush1.bf16.msra.mxu0 %v3197_v3  ;;  %959 = vmatprep.subr.bf16.mxu1 %v3268_v33  ;;  %v3296_v3 = vld [vmem:[#allocation7 + $0x1a0] ss:$8 sps:$4 sm:$0xff]  }
  0xa1   :  { %463 = vmatprep.subr.bf16.mxu0 %v3202_v4  ;;  %v3301_v4 = vld [vmem:[#allocation7 + $0x1b4] ss:$8 sps:$4 sm:$0xff]   ;;  %v3338_v33 = vld [vmem:[#allocation7 + $0x280] ss:$8 sps:$4 sm:$0xff]  }
  0xa4   :  { %464 = vmatpush1.bf16.msra.mxu0 %v3200_v8  ;;  %v3307_v8 = vld [vmem:[#allocation7 + $0x1d4] ss:$8 sps:$4 sm:$0xff]  }
  0xa5   :  { %465 = vmatprep.subr.bf16.mxu0 %v3205_v9  ;;  %v3305_v9 = vld [vmem:[#allocation7 + $0x1d0] ss:$8 sps:$4 sm:$0xff]  }
  0xa8   :  { %466 = vmatpush1.bf16.msra.mxu0 %v3203_v12  ;;  %v3313_v12 = vld [vmem:[#allocation7 + $0x1f4] ss:$8 sps:$4 sm:$0xff]  }
  0xa9   :  { %467 = vmatprep.subr.bf16.mxu0 %v3208_v14  ;;  %v3311_v14 = vld [vmem:[#allocation7 + $0x1f0] ss:$8 sps:$4 sm:$0xff]  }
  0xac   :  { %468 = vmatpush1.bf16.msra.mxu0 %v3206_v17  ;;  %v3319_v17 = vld [vmem:[#allocation7 + $0x214] ss:$8 sps:$4 sm:$0xff]  }
  0xad   :  { %469 = vmatprep.subr.bf16.mxu0 %v3211_v18  ;;  %v3317_v18 = vld [vmem:[#allocation7 + $0x210] ss:$8 sps:$4 sm:$0xff]  }
  0xb0   :  { %470 = vmatpush1.bf16.msra.mxu0 %v3209_v21  ;;  %v3325_v21 = vld [vmem:[#allocation7 + $0x234] ss:$8 sps:$4 sm:$0xff]  }
  0xb1   :  { %471 = vmatprep.subr.bf16.mxu0 %v3214_v22  ;;  %v3323_v22 = vld [vmem:[#allocation7 + $0x230] ss:$8 sps:$4 sm:$0xff]  }
  0xb4   :  { %472 = vmatpush1.bf16.msra.mxu0 %v3212_v25  ;;  %v3326_v25 = vld [vmem:[#allocation7 + $0x240] ss:$8 sps:$4 sm:$0xff]  }
  0xb5   :  { %473 = vmatprep.subr.bf16.mxu0 %v3217_v26  ;;  %v3331_v26 = vld [vmem:[#allocation7 + $0x254] ss:$8 sps:$4 sm:$0xff]  }
  0xb8   :  { %474 = vmatpush1.bf16.msra.mxu0 %v3215_v27  ;;  %v3329_v27 = vld [vmem:[#allocation7 + $0x250] ss:$8 sps:$4 sm:$0xff]  }
  0xb9   :  { %1212 = vmatprep.subr.bf16.mxu0 %v3316_v16  ;;  %v3388_v16 = vld [vmem:[#allocation7 + $0x384] ss:$8 sps:$4 sm:$0xff]  }
  0xbb   :  { %492 = vmatmul.mubr.bf16.vlgmr.msra.gmra.mrb[0].mxu0 %v165_v28  ;;  %v3334_v28 = vld [vmem:[#allocation7 + $0x264] ss:$8 sps:$4 sm:$0xff]  }
  0xbc   :  { %1213 = vmatpush1.bf16.msra.mxu0 %v3314_v15  ;;  %v3383_v15 = vld [vmem:[#allocation7 + $0x370] ss:$8 sps:$4 sm:$0xff]  }
  0xbd   :  { %1214 = vmatprep.subr.bf16.mxu0 %v3319_v17  ;;  %v3386_v17 = vld [vmem:[#allocation7 + $0x380] ss:$8 sps:$4 sm:$0xff]  }
  0xc0   :  { %1215 = vmatpush1.bf16.msra.mxu0 %v3317_v18  ;;  %v3391_v18 = vld [vmem:[#allocation7 + $0x394] ss:$8 sps:$4 sm:$0xff]  }
  0xc1   :  { %1216 = vmatprep.subr.bf16.mxu0 %v3322_v19  ;;  %v3389_v19 = vld [vmem:[#allocation7 + $0x390] ss:$8 sps:$4 sm:$0xff]  }
  0xc4   :  { %1217 = vmatpush1.bf16.msra.mxu0 %v3320_v20  ;;  %v3394_v20 = vld [vmem:[#allocation7 + $0x3a4] ss:$8 sps:$4 sm:$0xff]  }
  0xc5   :  { %1218 = vmatprep.subr.bf16.mxu0 %v3325_v21  ;;  %v3392_v21 = vld [vmem:[#allocation7 + $0x3a0] ss:$8 sps:$4 sm:$0xff]  }
  0xc8   :  { %1219 = vmatpush1.bf16.msra.mxu0 %v3323_v22  ;;  %v3397_v22 = vld [vmem:[#allocation7 + $0x3b4] ss:$8 sps:$4 sm:$0xff]  }
  0xc9   :  { %1220 = vmatprep.subr.bf16.mxu0 %v3328_v23  ;;  %v3395_v23 = vld [vmem:[#allocation7 + $0x3b0] ss:$8 sps:$4 sm:$0xff]  }
  0xcc   :  { %1221 = vmatpush1.bf16.msra.mxu0 %v3326_v25  ;;  %v3400_v25 = vld [vmem:[#allocation7 + $0x3c4] ss:$8 sps:$4 sm:$0xff]  }
  0xcd   :  { %1222 = vmatprep.subr.bf16.mxu0 %v3331_v26  ;;  %v3398_v26 = vld [vmem:[#allocation7 + $0x3c0] ss:$8 sps:$4 sm:$0xff]  }
  0xd0   :  { %1223 = vmatpush1.bf16.msra.mxu0 %v3329_v27  ;;  %v3403_v27 = vld [vmem:[#allocation7 + $0x3d4] ss:$8 sps:$4 sm:$0xff]  }
  0xd1   :  { %1224 = vmatprep.subr.bf16.mxu0 %v3334_v28  ;;  %v3401_v28 = vld [vmem:[#allocation7 + $0x3d0] ss:$8 sps:$4 sm:$0xff]  }
  0xd4   :  { %1225 = vmatpush1.bf16.msra.mxu0 %v3332_v29  ;;  %v787_v29 = vld [vmem:[#allocation8 + $0x2] sm:$0x3] }
  0xd5   :  { %1226 = vmatprep.subr.bf16.mxu0 %v3337_v30  ;;  %v792_v30 = vrot.slane %v787_v29, %v3932_v34 }
  0xd8   :  { %1227 = vmatpush1.bf16.msra.mxu0 %v3335_v31  ;;  %v796_v31 = vrot.slane %v787_v29, %v3935_v35  ;;  %v3457_v29 = vld [vmem:[#allocation7 + $0x4f4] ss:$8 sps:$4 sm:$0xff]  }
  0xd9   :  { %1228 = vmatprep.subr.bf16.mxu0 %v3340_v32 }
  0xdc   :  { %1229 = vmatpush1.bf16.msra.mxu0 %v3338_v33 }
  0xdd   :  { %1230 = vmatprep.subr.bf16.mxu0 %v3343_v24 }
 0x18e   :  { %v493_v38 = vpop.f32.mrb[0].mxu0 }
 0x18f   :  { %v3127_v39 = vadd.f32 %v493_v38, %v171_v36  ;;  %v495_v40 = vpop.f32.mrb[1].mxu0  ;;  %v3341_v36 = vld [vmem:[#allocation7 + $0x290] ss:$8 sps:$4 sm:$0xff]   ;;  %v3344_v38 = vld [vmem:[#allocation7 + $0x2a0] ss:$8 sps:$4 sm:$0xff]  }
 0x190   :  { %v3128_v41 = vadd.f32 %v495_v40, %v175_v37  ;;  %v497_v42 = vpop.f32.mrb[2].mxu0  ;;  %v3346_v37 = vld [vmem:[#allocation7 + $0x2a4] ss:$8 sps:$4 sm:$0xff]   ;;  %1231 = vmatpush1.bf16.msra.mxu0 %v3341_v36  ;;  %v3347_v40 = vld [vmem:[#allocation7 + $0x2b0] ss:$8 sps:$4 sm:$0xff]  }
 0x191   :  { %v3942_v43 = vmax.f32 %v3127_v39, 0.0  ;;  %v498_v44 = vpop.f32.mrb[3].mxu0  ;;  %1232 = vmatprep.subr.bf16.mxu0 %v3346_v37  ;;  %v3349_v39 = vld [vmem:[#allocation7 + $0x2b4] ss:$8 sps:$4 sm:$0xff]   ;;  %v3350_v42 = vld [vmem:[#allocation7 + $0x2c0] ss:$8 sps:$4 sm:$0xff]  }
 0x192   :  { %v3944_v45 = vmax.f32 %v3128_v41, 0.0  ;;  %v3352_v41 = vld [vmem:[#allocation7 + $0x2c4] ss:$8 sps:$4 sm:$0xff]   ;;  %v3355_v44 = vld [vmem:[#allocation7 + $0x2d4] ss:$8 sps:$4 sm:$0xff]  }
 0x193   :  { %v534_v47 = vpack.c.bf16 %v3942_v43, %v3942_v43 }
 0x194   :  { %v535_v13 = vpack.c.bf16 %v3944_v45, %v3944_v45  ;;  %1233 = vmatpush1.bf16.msra.mxu0 %v3344_v38 }
 0x195   :  { %1234 = vmatprep.subr.bf16.mxu0 %v3349_v39 }
 0x196   :  { %740 = vmatprep.mubr.bf16.mxu1 %v535_v13  ;;  %v3353_v13 = vld [vmem:[#allocation7 + $0x2d0] ss:$8 sps:$4 sm:$0xff]  }
 0x197   :  { %741 = vmatmul.mubr.bf16.vlgmr.msra.gmra.mrb[0].mxu1 %v534_v47 }
 0x198   :  { %960 = vmatpush1.bf16.msra.mxu1 %v3266_v46  ;;  %1235 = vmatpush1.bf16.msra.mxu0 %v3347_v40  ;;  %v536_v46 = vld [vmem:[#allocation8] sm:$0x3] }
 0x199   :  { %961 = vmatprep.subr.bf16.mxu1 %v3271_v48  ;;  %1236 = vmatprep.subr.bf16.mxu0 %v3352_v41  ;;  %v541_v47 = vrot.slane %v536_v46, %v3932_v34  ;;  %v545_v48 = vrot.slane %v536_v46, %v3935_v35  ;;  %v3406_v46 = vld [vmem:[#allocation7 + $0x3e4] ss:$8 sps:$4 sm:$0xff]  }
 0x19c   :  { %962 = vmatpush1.bf16.msra.mxu1 %v3269_v49  ;;  %1237 = vmatpush1.bf16.msra.mxu0 %v3350_v42 }
 0x19d   :  { %963 = vmatprep.subr.bf16.mxu1 %v3274_v50  ;;  %1238 = vmatprep.subr.bf16.mxu0 %v3355_v44 }
 0x1a0   :  { %964 = vmatpush1.bf16.msra.mxu1 %v3272_v51  ;;  %1239 = vmatpush1.bf16.msra.mxu0 %v3353_v13 }
 0x1a1   :  { %965 = vmatprep.subr.bf16.mxu1 %v3277_v52 }
 0x1a4   :  { %966 = vmatpush1.bf16.msra.mxu1 %v3275_v53 }
 0x1a5   :  { %967 = vmatprep.subr.bf16.mxu1 %v3280_v54 }
 0x1a8   :  { %968 = vmatpush1.bf16.msra.mxu1 %v3278_v55 }
 0x1a9   :  { %969 = vmatprep.subr.bf16.mxu1 %v3283_v56 }
 0x1ac   :  { %970 = vmatpush1.bf16.msra.mxu1 %v3281_v57 }
 0x1ad   :  { %971 = vmatprep.subr.bf16.mxu1 %v3286_v58 }
 0x1b0   :  { %972 = vmatpush1.bf16.msra.mxu1 %v3284_v59  ;;  %v3358_v59 = vld [vmem:[#allocation7 + $0x2e4] ss:$8 sps:$4 sm:$0xff]  }
 0x1b1   :  { %973 = vmatprep.subr.bf16.mxu1 %v3289_v60  ;;  %v3356_v60 = vld [vmem:[#allocation7 + $0x2e0] ss:$8 sps:$4 sm:$0xff]   ;;  %1240 = vmatprep.subr.bf16.mxu0 %v3358_v59  ;;  %v3425_v59 = vld [vmem:[#allocation7 + $0x450] ss:$8 sps:$4 sm:$0xff]  }
 0x1b2   :  { %1241 = vmatpush1.bf16.msra.mxu0 %v3356_v60  ;;  %v3430_v60 = vld [vmem:[#allocation7 + $0x464] ss:$8 sps:$4 sm:$0xff]  }
 0x1b4   :  { %974 = vmatpush1.bf16.msra.mxu1 %v3287_v61  ;;  %v3361_v61 = vld [vmem:[#allocation7 + $0x2f4] ss:$8 sps:$4 sm:$0xff]  }
 0x1b5   :  { %975 = vmatprep.subr.bf16.mxu1 %v3292_v62  ;;  %v3359_v62 = vld [vmem:[#allocation7 + $0x2f0] ss:$8 sps:$4 sm:$0xff]   ;;  %1242 = vmatprep.subr.bf16.mxu0 %v3361_v61  ;;  %v3428_v61 = vld [vmem:[#allocation7 + $0x460] ss:$8 sps:$4 sm:$0xff]  }
 0x1b6   :  { %1243 = vmatpush1.bf16.msra.mxu0 %v3359_v62  ;;  %v3433_v62 = vld [vmem:[#allocation7 + $0x474] ss:$8 sps:$4 sm:$0xff]  }
 0x1b8   :  { %976 = vmatpush1.bf16.msra.mxu1 %v3290_v63  ;;  %v3362_v63 = vld [vmem:[#allocation7 + $0x300] ss:$8 sps:$4 sm:$0xff]  }
 0x1b9   :  { %977 = vmatprep.subr.bf16.mxu1 %v3295_v0  ;;  %v3364_v0 = vld [vmem:[#allocation7 + $0x304] ss:$8 sps:$4 sm:$0xff]  }
 0x1bc   :  { %978 = vmatpush1.bf16.msra.mxu1 %v3293_v1  ;;  %v3367_v1 = vld [vmem:[#allocation7 + $0x314] ss:$8 sps:$4 sm:$0xff]  }
 0x1bd   :  { %979 = vmatprep.subr.bf16.mxu1 %v3298_v2  ;;  %v3365_v2 = vld [vmem:[#allocation7 + $0x310] ss:$8 sps:$4 sm:$0xff]  }
 0x1c0   :  { %980 = vmatpush1.bf16.msra.mxu1 %v3296_v3  ;;  %v3370_v3 = vld [vmem:[#allocation7 + $0x324] ss:$8 sps:$4 sm:$0xff]  }
 0x1c1   :  { %981 = vmatprep.subr.bf16.mxu1 %v3301_v4  ;;  %v3368_v4 = vld [vmem:[#allocation7 + $0x320] ss:$8 sps:$4 sm:$0xff]  }
 0x1c4   :  { %982 = vmatpush1.bf16.msra.mxu1 %v3299_v5  ;;  %v3373_v5 = vld [vmem:[#allocation7 + $0x334] ss:$8 sps:$4 sm:$0xff]  }
 0x1c5   :  { %983 = vmatprep.subr.bf16.mxu1 %v3304_v6  ;;  %v3371_v6 = vld [vmem:[#allocation7 + $0x330] ss:$8 sps:$4 sm:$0xff]  }
 0x1c8   :  { %984 = vmatpush1.bf16.msra.mxu1 %v3302_v7  ;;  %v3376_v7 = vld [vmem:[#allocation7 + $0x344] ss:$8 sps:$4 sm:$0xff]  }
 0x1c9   :  { %985 = vmatprep.subr.bf16.mxu1 %v3307_v8  ;;  %v3374_v8 = vld [vmem:[#allocation7 + $0x340] ss:$8 sps:$4 sm:$0xff]  }
 0x1cc   :  { %986 = vmatpush1.bf16.msra.mxu1 %v3305_v9  ;;  %v3379_v9 = vld [vmem:[#allocation7 + $0x354] ss:$8 sps:$4 sm:$0xff]  }
 0x1cd   :  { %987 = vmatprep.subr.bf16.mxu1 %v3310_v10  ;;  %v3377_v10 = vld [vmem:[#allocation7 + $0x350] ss:$8 sps:$4 sm:$0xff]  }
 0x1d0   :  { %988 = vmatpush1.bf16.msra.mxu1 %v3308_v11  ;;  %v3382_v11 = vld [vmem:[#allocation7 + $0x364] ss:$8 sps:$4 sm:$0xff]  }
 0x1d1   :  { %989 = vmatprep.subr.bf16.mxu1 %v3313_v12  ;;  %v3380_v12 = vld [vmem:[#allocation7 + $0x360] ss:$8 sps:$4 sm:$0xff]  }
 0x1d4   :  { %990 = vmatpush1.bf16.msra.mxu1 %v3311_v14  ;;  %v3385_v14 = vld [vmem:[#allocation7 + $0x374] ss:$8 sps:$4 sm:$0xff]  }
 0x1d5   :  { %1463 = vmatprep.subr.bf16.mxu1 %v3364_v0  ;;  %v3436_v0 = vld [vmem:[#allocation7 + $0x484] ss:$8 sps:$4 sm:$0xff]  }
 0x26a   :  { %v742_v49 = vpop.f32.mrb[0].mxu1 }
 0x26b   :  { %v743_v50 = vadd.f32 %v742_v49, %v541_v47  ;;  %v744_v51 = vpop.f32.mrb[1].mxu1  ;;  %v3404_v47 = vld [vmem:[#allocation7 + $0x3e0] ss:$8 sps:$4 sm:$0xff]   ;;  %v3407_v49 = vld [vmem:[#allocation7 + $0x3f0] ss:$8 sps:$4 sm:$0xff]  }
 0x26c   :  { %v745_v52 = vadd.f32 %v744_v51, %v545_v48  ;;  %v746_v53 = vpop.f32.mrb[2].mxu1  ;;  %v3409_v48 = vld [vmem:[#allocation7 + $0x3f4] ss:$8 sps:$4 sm:$0xff]   ;;  %v3412_v51 = vld [vmem:[#allocation7 + $0x404] ss:$8 sps:$4 sm:$0xff]  }
 0x26d   :  { %v749_v54 = vmax.f32 %v743_v50, 0.0  ;;  %v747_v55 = vpop.f32.mrb[3].mxu1  ;;  %v3410_v50 = vld [vmem:[#allocation7 + $0x400] ss:$8 sps:$4 sm:$0xff]   ;;  %1716 = vmatprep.subr.bf16.mxu0 %v3412_v51  ;;  %v3487_v51 = vld [vmem:[#allocation7 + $0x594] ss:$8 sps:$4 sm:$0xff]  }
 0x26e   :  { %v750_v56 = vmax.f32 %v745_v52, 0.0  ;;  %v3415_v52 = vld [vmem:[#allocation7 + $0x414] ss:$8 sps:$4 sm:$0xff]   ;;  %v3416_v53 = vld [vmem:[#allocation7 + $0x420] ss:$8 sps:$4 sm:$0xff]  }
 0x26f   :  { %v784_v58 = vpack.c.bf16 %v749_v54, %v749_v54  ;;  %v3421_v54 = vld [vmem:[#allocation7 + $0x434] ss:$8 sps:$4 sm:$0xff]   ;;  %v3419_v55 = vld [vmem:[#allocation7 + $0x430] ss:$8 sps:$4 sm:$0xff]  }
 0x270   :  { %v785_v57 = vpack.c.bf16 %v750_v56, %v750_v56  ;;  %v3424_v56 = vld [vmem:[#allocation7 + $0x444] ss:$8 sps:$4 sm:$0xff]  }
 0x272   :  { %991 = vmatprep.mubr.bf16.mxu1 %v785_v57  ;;  %v3422_v57 = vld [vmem:[#allocation7 + $0x440] ss:$8 sps:$4 sm:$0xff]  }
 0x273   :  { %992 = vmatmul.mubr.bf16.vlgmr.msra.gmra.mrb[4].mxu1 %v784_v58  ;;  %v3427_v58 = vld [vmem:[#allocation7 + $0x454] ss:$8 sps:$4 sm:$0xff]  }
 0x274   :  { %1464 = vmatpush1.bf16.msra.mxu1 %v3362_v63  ;;  %v3431_v63 = vld [vmem:[#allocation7 + $0x470] ss:$8 sps:$4 sm:$0xff]  }
 0x275   :  { %1465 = vmatprep.subr.bf16.mxu1 %v3367_v1  ;;  %v3434_v1 = vld [vmem:[#allocation7 + $0x480] ss:$8 sps:$4 sm:$0xff]  }
 0x278   :  { %1466 = vmatpush1.bf16.msra.mxu1 %v3365_v2  ;;  %v3439_v2 = vld [vmem:[#allocation7 + $0x494] ss:$8 sps:$4 sm:$0xff]  }
 0x279   :  { %1467 = vmatprep.subr.bf16.mxu1 %v3370_v3  ;;  %v3437_v3 = vld [vmem:[#allocation7 + $0x490] ss:$8 sps:$4 sm:$0xff]  }
 0x27c   :  { %1468 = vmatpush1.bf16.msra.mxu1 %v3368_v4  ;;  %v3442_v4 = vld [vmem:[#allocation7 + $0x4a4] ss:$8 sps:$4 sm:$0xff]  }
 0x27d   :  { %1469 = vmatprep.subr.bf16.mxu1 %v3373_v5  ;;  %v3440_v5 = vld [vmem:[#allocation7 + $0x4a0] ss:$8 sps:$4 sm:$0xff]  }
 0x280   :  { %1470 = vmatpush1.bf16.msra.mxu1 %v3371_v6  ;;  %v3445_v6 = vld [vmem:[#allocation7 + $0x4b4] ss:$8 sps:$4 sm:$0xff]  }
 0x281   :  { %1471 = vmatprep.subr.bf16.mxu1 %v3376_v7  ;;  %v3443_v7 = vld [vmem:[#allocation7 + $0x4b0] ss:$8 sps:$4 sm:$0xff]  }
 0x284   :  { %1472 = vmatpush1.bf16.msra.mxu1 %v3374_v8  ;;  %v3448_v8 = vld [vmem:[#allocation7 + $0x4c4] ss:$8 sps:$4 sm:$0xff]  }
 0x285   :  { %1473 = vmatprep.subr.bf16.mxu1 %v3379_v9  ;;  %v3446_v9 = vld [vmem:[#allocation7 + $0x4c0] ss:$8 sps:$4 sm:$0xff]  }
 0x288   :  { %1474 = vmatpush1.bf16.msra.mxu1 %v3377_v10  ;;  %v3451_v10 = vld [vmem:[#allocation7 + $0x4d4] ss:$8 sps:$4 sm:$0xff]  }
 0x289   :  { %1475 = vmatprep.subr.bf16.mxu1 %v3382_v11  ;;  %v3449_v11 = vld [vmem:[#allocation7 + $0x4d0] ss:$8 sps:$4 sm:$0xff]  }
 0x28c   :  { %1476 = vmatpush1.bf16.msra.mxu1 %v3380_v12  ;;  %v1040_v12 = vld [vmem:[#allocation8 + $0x4] sm:$0x3] }
 0x28d   :  { %1477 = vmatprep.subr.bf16.mxu1 %v3385_v14  ;;  %v1045_v14 = vrot.slane %v1040_v12, %v3932_v34 }
 0x290   :  { %1478 = vmatpush1.bf16.msra.mxu1 %v3383_v15  ;;  %v1049_v15 = vrot.slane %v1040_v12, %v3935_v35  ;;  %v3505_v12 = vld [vmem:[#allocation7 + $0x5f4] ss:$8 sps:$4 sm:$0xff]  }
 0x291   :  { %1479 = vmatprep.subr.bf16.mxu1 %v3388_v16 }
 0x294   :  { %1480 = vmatpush1.bf16.msra.mxu1 %v3386_v17 }
 0x295   :  { %1481 = vmatprep.subr.bf16.mxu1 %v3391_v18 }
 0x298   :  { %1482 = vmatpush1.bf16.msra.mxu1 %v3389_v19 }
 0x299   :  { %1483 = vmatprep.subr.bf16.mxu1 %v3394_v20 }
 0x29c   :  { %1484 = vmatpush1.bf16.msra.mxu1 %v3392_v21 }
 0x29d   :  { %1485 = vmatprep.subr.bf16.mxu1 %v3397_v22 }
 0x2a0   :  { %1486 = vmatpush1.bf16.msra.mxu1 %v3395_v23 }
 0x2a1   :  { %1487 = vmatprep.subr.bf16.mxu1 %v3400_v25 }
 0x2a4   :  { %1488 = vmatpush1.bf16.msra.mxu1 %v3398_v26 }
 0x2a5   :  { %1489 = vmatprep.subr.bf16.mxu1 %v3403_v27  ;;  %v3454_v27 = vld [vmem:[#allocation7 + $0x4e4] ss:$8 sps:$4 sm:$0xff]  }
 0x2a8   :  { %1490 = vmatpush1.bf16.msra.mxu1 %v3401_v28  ;;  %v3452_v28 = vld [vmem:[#allocation7 + $0x4e0] ss:$8 sps:$4 sm:$0xff]  }
 0x2a9   :  { %1491 = vmatprep.subr.bf16.mxu1 %v3406_v46  ;;  %v3476_v46 = vld [vmem:[#allocation7 + $0x560] ss:$8 sps:$4 sm:$0xff]  }
 0x2ac   :  { %1492 = vmatpush1.bf16.msra.mxu1 %v3404_v47  ;;  %v3481_v47 = vld [vmem:[#allocation7 + $0x574] ss:$8 sps:$4 sm:$0xff]  }
 0x2ad   :  { %1493 = vmatprep.subr.bf16.mxu1 %v3409_v48  ;;  %v3479_v48 = vld [vmem:[#allocation7 + $0x570] ss:$8 sps:$4 sm:$0xff]  }
 0x2b0   :  { %1494 = vmatpush1.bf16.msra.mxu1 %v3407_v49  ;;  %v3484_v49 = vld [vmem:[#allocation7 + $0x584] ss:$8 sps:$4 sm:$0xff]  }
 0x346   :  { %v993_v32 = vpop.f32.mrb[4].mxu1 }
 0x347   :  { %v994_v33 = vadd.f32 %v993_v32, %v792_v30  ;;  %v995_v24 = vpop.f32.mrb[5].mxu1  ;;  %v3455_v30 = vld [vmem:[#allocation7 + $0x4f0] ss:$8 sps:$4 sm:$0xff]   ;;  %v3460_v32 = vld [vmem:[#allocation7 + $0x504] ss:$8 sps:$4 sm:$0xff]  }
 0x348   :  { %v996_v36 = vadd.f32 %v995_v24, %v796_v31  ;;  %v997_v37 = vpop.f32.mrb[6].mxu1  ;;  %v3458_v31 = vld [vmem:[#allocation7 + $0x500] ss:$8 sps:$4 sm:$0xff]   ;;  %1967 = vmatprep.subr.bf16.mxu1 %v3460_v32  ;;  %v3461_v24 = vld [vmem:[#allocation7 + $0x510] ss:$8 sps:$4 sm:$0xff]  }
 0x349   :  { %v1000_v38 = vmax.f32 %v994_v33, 0.0  ;;  %v998_v39 = vpop.f32.mrb[7].mxu1  ;;  %v3463_v33 = vld [vmem:[#allocation7 + $0x514] ss:$8 sps:$4 sm:$0xff]   ;;  %v3464_v37 = vld [vmem:[#allocation7 + $0x520] ss:$8 sps:$4 sm:$0xff]  }
 0x34a   :  { %v1001_v40 = vmax.f32 %v996_v36, 0.0  ;;  %v3466_v36 = vld [vmem:[#allocation7 + $0x524] ss:$8 sps:$4 sm:$0xff]   ;;  %v3467_v39 = vld [vmem:[#allocation7 + $0x530] ss:$8 sps:$4 sm:$0xff]  }
 0x34b   :  { %v1002_v41 = vadd.f32 %v1000_v38, %v3942_v43  ;;  %v3413_v43 = vld [vmem:[#allocation7 + $0x410] ss:$8 sps:$4 sm:$0xff]   ;;  %v3469_v38 = vld [vmem:[#allocation7 + $0x534] ss:$8 sps:$4 sm:$0xff]   ;;  %v3532_v32 = vld [vmem:[#allocation7 + $0x684] ss:$8 sps:$4 sm:$0xff]  }
 0x34c   :  { %v1003_v42 = vadd.f32 %v1001_v40, %v3944_v45  ;;  %v3418_v45 = vld [vmem:[#allocation7 + $0x424] ss:$8 sps:$4 sm:$0xff]  }
 0x34d   :  { %v1037_v13 = vpack.c.bf16 %v1002_v41, %v1002_v41  ;;  %v3472_v40 = vld [vmem:[#allocation7 + $0x544] ss:$8 sps:$4 sm:$0xff]   ;;  %v3470_v41 = vld [vmem:[#allocation7 + $0x540] ss:$8 sps:$4 sm:$0xff]  }
 0x34e   :  { %v1038_v44 = vpack.c.bf16 %v1003_v42, %v1003_v42  ;;  %v3475_v42 = vld [vmem:[#allocation7 + $0x554] ss:$8 sps:$4 sm:$0xff]  }
 0x350   :  { %1244 = vmatprep.mubr.bf16.mxu0 %v1038_v44  ;;  %v3473_v44 = vld [vmem:[#allocation7 + $0x550] ss:$8 sps:$4 sm:$0xff]  }
 0x351   :  { %1245 = vmatmul.mubr.bf16.vlgmr.msra.gmra.mrb[4].mxu0 %v1037_v13  ;;  %v3478_v13 = vld [vmem:[#allocation7 + $0x564] ss:$8 sps:$4 sm:$0xff]  }
 0x352   :  { %1717 = vmatpush1.bf16.msra.mxu0 %v3410_v50  ;;  %v3482_v50 = vld [vmem:[#allocation7 + $0x580] ss:$8 sps:$4 sm:$0xff]  }
 0x353   :  { %1718 = vmatprep.subr.bf16.mxu0 %v3415_v52  ;;  %v3485_v52 = vld [vmem:[#allocation7 + $0x590] ss:$8 sps:$4 sm:$0xff]  }
 0x356   :  { %1719 = vmatpush1.bf16.msra.mxu0 %v3413_v43  ;;  %v3490_v43 = vld [vmem:[#allocation7 + $0x5a4] ss:$8 sps:$4 sm:$0xff]  }
 0x357   :  { %1720 = vmatprep.subr.bf16.mxu0 %v3418_v45  ;;  %v3488_v45 = vld [vmem:[#allocation7 + $0x5a0] ss:$8 sps:$4 sm:$0xff]  }
 0x35a   :  { %1721 = vmatpush1.bf16.msra.mxu0 %v3416_v53  ;;  %v3493_v53 = vld [vmem:[#allocation7 + $0x5b4] ss:$8 sps:$4 sm:$0xff]  }
 0x35b   :  { %1722 = vmatprep.subr.bf16.mxu0 %v3421_v54  ;;  %v3491_v54 = vld [vmem:[#allocation7 + $0x5b0] ss:$8 sps:$4 sm:$0xff]  }
 0x35e   :  { %1723 = vmatpush1.bf16.msra.mxu0 %v3419_v55  ;;  %v3496_v55 = vld [vmem:[#allocation7 + $0x5c4] ss:$8 sps:$4 sm:$0xff]  }
 0x35f   :  { %1724 = vmatprep.subr.bf16.mxu0 %v3424_v56  ;;  %v3494_v56 = vld [vmem:[#allocation7 + $0x5c0] ss:$8 sps:$4 sm:$0xff]  }
 0x362   :  { %1725 = vmatpush1.bf16.msra.mxu0 %v3422_v57  ;;  %v3499_v57 = vld [vmem:[#allocation7 + $0x5d4] ss:$8 sps:$4 sm:$0xff]  }
 0x363   :  { %1726 = vmatprep.subr.bf16.mxu0 %v3427_v58  ;;  %v3497_v58 = vld [vmem:[#allocation7 + $0x5d0] ss:$8 sps:$4 sm:$0xff]  }
 0x366   :  { %1727 = vmatpush1.bf16.msra.mxu0 %v3425_v59  ;;  %v1291_v59 = vld [vmem:[#allocation8 + $0x6] sm:$0x3] }
 0x367   :  { %1728 = vmatprep.subr.bf16.mxu0 %v3430_v60  ;;  %v1296_v60 = vrot.slane %v1291_v59, %v3932_v34 }
 0x36a   :  { %1729 = vmatpush1.bf16.msra.mxu0 %v3428_v61  ;;  %v1300_v61 = vrot.slane %v1291_v59, %v3935_v35  ;;  %v3553_v59 = vld [vmem:[#allocation7 + $0x6f4] ss:$8 sps:$4 sm:$0xff]  }
 0x36b   :  { %1730 = vmatprep.subr.bf16.mxu0 %v3433_v62 }
 0x36e   :  { %1731 = vmatpush1.bf16.msra.mxu0 %v3431_v63 }
 0x36f   :  { %1732 = vmatprep.subr.bf16.mxu0 %v3436_v0 }
 0x372   :  { %1733 = vmatpush1.bf16.msra.mxu0 %v3434_v1 }
 0x373   :  { %1734 = vmatprep.subr.bf16.mxu0 %v3439_v2 }
 0x376   :  { %1735 = vmatpush1.bf16.msra.mxu0 %v3437_v3 }
 0x377   :  { %1736 = vmatprep.subr.bf16.mxu0 %v3442_v4 }
 0x37a   :  { %1737 = vmatpush1.bf16.msra.mxu0 %v3440_v5 }
 0x37b   :  { %1738 = vmatprep.subr.bf16.mxu0 %v3445_v6 }
 0x37e   :  { %1739 = vmatpush1.bf16.msra.mxu0 %v3443_v7 }
 0x37f   :  { %1740 = vmatprep.subr.bf16.mxu0 %v3448_v8 }
 0x382   :  { %1741 = vmatpush1.bf16.msra.mxu0 %v3446_v9 }
 0x383   :  { %1742 = vmatprep.subr.bf16.mxu0 %v3451_v10  ;;  %v3502_v10 = vld [vmem:[#allocation7 + $0x5e4] ss:$8 sps:$4 sm:$0xff]  }
 0x386   :  { %1743 = vmatpush1.bf16.msra.mxu0 %v3449_v11  ;;  %v3500_v11 = vld [vmem:[#allocation7 + $0x5e0] ss:$8 sps:$4 sm:$0xff]  }
 0x387   :  { %1744 = vmatprep.subr.bf16.mxu0 %v3454_v27  ;;  %v3521_v27 = vld [vmem:[#allocation7 + $0x650] ss:$8 sps:$4 sm:$0xff]  }
 0x38a   :  { %1745 = vmatpush1.bf16.msra.mxu0 %v3452_v28  ;;  %v3526_v28 = vld [vmem:[#allocation7 + $0x664] ss:$8 sps:$4 sm:$0xff]  }
 0x38b   :  { %1746 = vmatprep.subr.bf16.mxu0 %v3457_v29  ;;  %v3524_v29 = vld [vmem:[#allocation7 + $0x660] ss:$8 sps:$4 sm:$0xff]  }
 0x38e   :  { %1747 = vmatpush1.bf16.msra.mxu0 %v3455_v30  ;;  %v3529_v30 = vld [vmem:[#allocation7 + $0x674] ss:$8 sps:$4 sm:$0xff]  }
 0x424   :  { %v1246_v16 = vpop.f32.mrb[4].mxu0 }
 0x425   :  { %v1247_v17 = vadd.f32 %v1246_v16, %v1045_v14  ;;  %v1248_v18 = vpop.f32.mrb[5].mxu0  ;;  %v3503_v14 = vld [vmem:[#allocation7 + $0x5f0] ss:$8 sps:$4 sm:$0xff]   ;;  %v3508_v16 = vld [vmem:[#allocation7 + $0x604] ss:$8 sps:$4 sm:$0xff]  }
 0x426   :  { %v1249_v19 = vadd.f32 %v1248_v18, %v1049_v15  ;;  %v1250_v20 = vpop.f32.mrb[6].mxu0  ;;  %v3506_v15 = vld [vmem:[#allocation7 + $0x600] ss:$8 sps:$4 sm:$0xff]   ;;  %2220 = vmatprep.subr.bf16.mxu0 %v3508_v16  ;;  %v3509_v18 = vld [vmem:[#allocation7 + $0x610] ss:$8 sps:$4 sm:$0xff]  }
 0x427   :  { %v3958_v21 = vmax.f32 %v1247_v17, 0.0  ;;  %v1251_v22 = vpop.f32.mrb[7].mxu0  ;;  %v3511_v17 = vld [vmem:[#allocation7 + $0x614] ss:$8 sps:$4 sm:$0xff]   ;;  %v3512_v20 = vld [vmem:[#allocation7 + $0x620] ss:$8 sps:$4 sm:$0xff]  }
 0x428   :  { %v3960_v23 = vmax.f32 %v1249_v19, 0.0  ;;  %v3514_v19 = vld [vmem:[#allocation7 + $0x624] ss:$8 sps:$4 sm:$0xff]   ;;  %v3515_v22 = vld [vmem:[#allocation7 + $0x630] ss:$8 sps:$4 sm:$0xff]  }
 0x429   :  { %v1288_v26 = vpack.c.bf16 %v3958_v21, %v3958_v21  ;;  %v3583_v16 = vld [vmem:[#allocation7 + $0x794] ss:$8 sps:$4 sm:$0xff]  }
 0x42a   :  { %v1289_v25 = vpack.c.bf16 %v3960_v23, %v3960_v23 }
 0x42c   :  { %1495 = vmatprep.mubr.bf16.mxu1 %v1289_v25  ;;  %v3518_v25 = vld [vmem:[#allocation7 + $0x640] ss:$8 sps:$4 sm:$0xff]  }
 0x42d   :  { %1496 = vmatmul.mubr.bf16.vlgmr.msra.gmra.mrb[8].mxu1 %v1288_v26  ;;  %v3523_v26 = vld [vmem:[#allocation7 + $0x654] ss:$8 sps:$4 sm:$0xff]  }
 0x42e   :  { %1968 = vmatpush1.bf16.msra.mxu1 %v3458_v31  ;;  %v3527_v31 = vld [vmem:[#allocation7 + $0x670] ss:$8 sps:$4 sm:$0xff]  }
 0x42f   :  { %1969 = vmatprep.subr.bf16.mxu1 %v3463_v33  ;;  %v3530_v33 = vld [vmem:[#allocation7 + $0x680] ss:$8 sps:$4 sm:$0xff]  }
 0x432   :  { %1970 = vmatpush1.bf16.msra.mxu1 %v3461_v24  ;;  %v3535_v24 = vld [vmem:[#allocation7 + $0x694] ss:$8 sps:$4 sm:$0xff]  }
 0x433   :  { %1971 = vmatprep.subr.bf16.mxu1 %v3466_v36  ;;  %v3533_v36 = vld [vmem:[#allocation7 + $0x690] ss:$8 sps:$4 sm:$0xff]  }
 0x436   :  { %1972 = vmatpush1.bf16.msra.mxu1 %v3464_v37  ;;  %v3538_v37 = vld [vmem:[#allocation7 + $0x6a4] ss:$8 sps:$4 sm:$0xff]  }
 0x437   :  { %1973 = vmatprep.subr.bf16.mxu1 %v3469_v38  ;;  %v3536_v38 = vld [vmem:[#allocation7 + $0x6a0] ss:$8 sps:$4 sm:$0xff]  }
 0x43a   :  { %1974 = vmatpush1.bf16.msra.mxu1 %v3467_v39  ;;  %v3541_v39 = vld [vmem:[#allocation7 + $0x6b4] ss:$8 sps:$4 sm:$0xff]  }
 0x43b   :  { %1975 = vmatprep.subr.bf16.mxu1 %v3472_v40  ;;  %v3539_v40 = vld [vmem:[#allocation7 + $0x6b0] ss:$8 sps:$4 sm:$0xff]  }
 0x43e   :  { %1976 = vmatpush1.bf16.msra.mxu1 %v3470_v41  ;;  %v3544_v41 = vld [vmem:[#allocation7 + $0x6c4] ss:$8 sps:$4 sm:$0xff]  }
 0x43f   :  { %1977 = vmatprep.subr.bf16.mxu1 %v3475_v42  ;;  %v3542_v42 = vld [vmem:[#allocation7 + $0x6c0] ss:$8 sps:$4 sm:$0xff]  }
 0x442   :  { %1978 = vmatpush1.bf16.msra.mxu1 %v3473_v44  ;;  %v3547_v44 = vld [vmem:[#allocation7 + $0x6d4] ss:$8 sps:$4 sm:$0xff]  }
 0x443   :  { %1979 = vmatprep.subr.bf16.mxu1 %v3478_v13  ;;  %v3545_v13 = vld [vmem:[#allocation7 + $0x6d0] ss:$8 sps:$4 sm:$0xff]  }
 0x446   :  { %1980 = vmatpush1.bf16.msra.mxu1 %v3476_v46  ;;  %v1544_v46 = vld [vmem:[#allocation8 + $0x8] sm:$0x3] }
 0x447   :  { %1981 = vmatprep.subr.bf16.mxu1 %v3481_v47  ;;  %v1549_v47 = vrot.slane %v1544_v46, %v3932_v34 }
 0x44a   :  { %1982 = vmatpush1.bf16.msra.mxu1 %v3479_v48  ;;  %v1553_v48 = vrot.slane %v1544_v46, %v3935_v35  ;;  %v3601_v46 = vld [vmem:[#allocation7 + $0x7f4] ss:$8 sps:$4 sm:$0xff]  }
 0x44b   :  { %1983 = vmatprep.subr.bf16.mxu1 %v3484_v49 }
 0x44e   :  { %1984 = vmatpush1.bf16.msra.mxu1 %v3482_v50 }
 0x44f   :  { %1985 = vmatprep.subr.bf16.mxu1 %v3487_v51 }
 0x452   :  { %1986 = vmatpush1.bf16.msra.mxu1 %v3485_v52 }
 0x453   :  { %1987 = vmatprep.subr.bf16.mxu1 %v3490_v43 }
 0x456   :  { %1988 = vmatpush1.bf16.msra.mxu1 %v3488_v45 }
 0x457   :  { %1989 = vmatprep.subr.bf16.mxu1 %v3493_v53 }
 0x45a   :  { %1990 = vmatpush1.bf16.msra.mxu1 %v3491_v54 }
 0x45b   :  { %1991 = vmatprep.subr.bf16.mxu1 %v3496_v55 }
 0x45e   :  { %1992 = vmatpush1.bf16.msra.mxu1 %v3494_v56 }
 0x45f   :  { %1993 = vmatprep.subr.bf16.mxu1 %v3499_v57  ;;  %v3550_v57 = vld [vmem:[#allocation7 + $0x6e4] ss:$8 sps:$4 sm:$0xff]  }
 0x462   :  { %1994 = vmatpush1.bf16.msra.mxu1 %v3497_v58  ;;  %v3548_v58 = vld [vmem:[#allocation7 + $0x6e0] ss:$8 sps:$4 sm:$0xff]  }
 0x463   :  { %1995 = vmatprep.subr.bf16.mxu1 %v3502_v10  ;;  %v3572_v10 = vld [vmem:[#allocation7 + $0x760] ss:$8 sps:$4 sm:$0xff]  }
 0x466   :  { %1996 = vmatpush1.bf16.msra.mxu1 %v3500_v11  ;;  %v3577_v11 = vld [vmem:[#allocation7 + $0x774] ss:$8 sps:$4 sm:$0xff]  }
 0x467   :  { %1997 = vmatprep.subr.bf16.mxu1 %v3505_v12  ;;  %v3575_v12 = vld [vmem:[#allocation7 + $0x770] ss:$8 sps:$4 sm:$0xff]  }
 0x46a   :  { %1998 = vmatpush1.bf16.msra.mxu1 %v3503_v14  ;;  %v3580_v14 = vld [vmem:[#allocation7 + $0x784] ss:$8 sps:$4 sm:$0xff]  }
 0x500   :  { %v1497_v62 = vpop.f32.mrb[8].mxu1 }
 0x501   :  { %v1498_v63 = vadd.f32 %v1497_v62, %v1296_v60  ;;  %v1499_v0 = vpop.f32.mrb[9].mxu1  ;;  %v3551_v60 = vld [vmem:[#allocation7 + $0x6f0] ss:$8 sps:$4 sm:$0xff]   ;;  %v3556_v62 = vld [vmem:[#allocation7 + $0x704] ss:$8 sps:$4 sm:$0xff]  }
 0x502   :  { %v1500_v1 = vadd.f32 %v1499_v0, %v1300_v61  ;;  %v1501_v2 = vpop.f32.mrb[10].mxu1  ;;  %v3554_v61 = vld [vmem:[#allocation7 + $0x700] ss:$8 sps:$4 sm:$0xff]   ;;  %2471 = vmatprep.subr.bf16.mxu1 %v3556_v62  ;;  %v3557_v0 = vld [vmem:[#allocation7 + $0x710] ss:$8 sps:$4 sm:$0xff]  }
 0x503   :  { %v1504_v3 = vmax.f32 %v1498_v63, 0.0  ;;  %v1502_v4 = vpop.f32.mrb[11].mxu1  ;;  %v3559_v63 = vld [vmem:[#allocation7 + $0x714] ss:$8 sps:$4 sm:$0xff]   ;;  %v3560_v2 = vld [vmem:[#allocation7 + $0x720] ss:$8 sps:$4 sm:$0xff]  }
 0x504   :  { %v1505_v5 = vmax.f32 %v1500_v1, 0.0  ;;  %v3562_v1 = vld [vmem:[#allocation7 + $0x724] ss:$8 sps:$4 sm:$0xff]   ;;  %v3563_v4 = vld [vmem:[#allocation7 + $0x730] ss:$8 sps:$4 sm:$0xff]  }
 0x505   :  { %v1506_v6 = vadd.f32 %v1504_v3, %v3958_v21  ;;  %v3517_v21 = vld [vmem:[#allocation7 + $0x634] ss:$8 sps:$4 sm:$0xff]  }
 0x506   :  { %v1507_v7 = vadd.f32 %v1505_v5, %v3960_v23  ;;  %v3520_v23 = vld [vmem:[#allocation7 + $0x644] ss:$8 sps:$4 sm:$0xff]   ;;  %v3565_v3 = vld [vmem:[#allocation7 + $0x734] ss:$8 sps:$4 sm:$0xff]  }
 0x507   :  { %v1541_v9 = vpack.c.bf16 %v1506_v6, %v1506_v6  ;;  %v3568_v5 = vld [vmem:[#allocation7 + $0x744] ss:$8 sps:$4 sm:$0xff]   ;;  %v3566_v6 = vld [vmem:[#allocation7 + $0x740] ss:$8 sps:$4 sm:$0xff]   ;;  %v3628_v62 = vld [vmem:[#allocation10 + $0x84] ss:$8 sps:$4 sm:$0xff]  }
 0x508   :  { %v1542_v8 = vpack.c.bf16 %v1507_v7, %v1507_v7  ;;  %v3571_v7 = vld [vmem:[#allocation7 + $0x754] ss:$8 sps:$4 sm:$0xff]  }
 0x50a   :  { %1748 = vmatprep.mubr.bf16.mxu0 %v1542_v8  ;;  %v3569_v8 = vld [vmem:[#allocation7 + $0x750] ss:$8 sps:$4 sm:$0xff]  }
 0x50b   :  { %1749 = vmatmul.mubr.bf16.vlgmr.msra.gmra.mrb[8].mxu0 %v1541_v9  ;;  %v3574_v9 = vld [vmem:[#allocation7 + $0x764] ss:$8 sps:$4 sm:$0xff]  }
 0x50c   :  { %2221 = vmatpush1.bf16.msra.mxu0 %v3506_v15  ;;  %v3578_v15 = vld [vmem:[#allocation7 + $0x780] ss:$8 sps:$4 sm:$0xff]  }
 0x50d   :  { %2222 = vmatprep.subr.bf16.mxu0 %v3511_v17  ;;  %v3581_v17 = vld [vmem:[#allocation7 + $0x790] ss:$8 sps:$4 sm:$0xff]  }
 0x510   :  { %2223 = vmatpush1.bf16.msra.mxu0 %v3509_v18  ;;  %v3586_v18 = vld [vmem:[#allocation7 + $0x7a4] ss:$8 sps:$4 sm:$0xff]  }
 0x511   :  { %2224 = vmatprep.subr.bf16.mxu0 %v3514_v19  ;;  %v3584_v19 = vld [vmem:[#allocation7 + $0x7a0] ss:$8 sps:$4 sm:$0xff]  }
 0x514   :  { %2225 = vmatpush1.bf16.msra.mxu0 %v3512_v20  ;;  %v3589_v20 = vld [vmem:[#allocation7 + $0x7b4] ss:$8 sps:$4 sm:$0xff]  }
 0x515   :  { %2226 = vmatprep.subr.bf16.mxu0 %v3517_v21  ;;  %v3587_v21 = vld [vmem:[#allocation7 + $0x7b0] ss:$8 sps:$4 sm:$0xff]  }
 0x518   :  { %2227 = vmatpush1.bf16.msra.mxu0 %v3515_v22  ;;  %v3592_v22 = vld [vmem:[#allocation7 + $0x7c4] ss:$8 sps:$4 sm:$0xff]  }
 0x519   :  { %2228 = vmatprep.subr.bf16.mxu0 %v3520_v23  ;;  %v3590_v23 = vld [vmem:[#allocation7 + $0x7c0] ss:$8 sps:$4 sm:$0xff]  }
 0x51c   :  { %2229 = vmatpush1.bf16.msra.mxu0 %v3518_v25  ;;  %v3595_v25 = vld [vmem:[#allocation7 + $0x7d4] ss:$8 sps:$4 sm:$0xff]  }
 0x51d   :  { %2230 = vmatprep.subr.bf16.mxu0 %v3523_v26  ;;  %v3593_v26 = vld [vmem:[#allocation7 + $0x7d0] ss:$8 sps:$4 sm:$0xff]  }
 0x520   :  { %2231 = vmatpush1.bf16.msra.mxu0 %v3521_v27  ;;  %v1795_v27 = vld [vmem:[#allocation8 + $0xa] sm:$0x3] }
 0x521   :  { %2232 = vmatprep.subr.bf16.mxu0 %v3526_v28  ;;  %v1800_v28 = vrot.slane %v1795_v27, %v3932_v34 }
 0x524   :  { %2233 = vmatpush1.bf16.msra.mxu0 %v3524_v29  ;;  %v1804_v29 = vrot.slane %v1795_v27, %v3935_v35  ;;  %v3649_v27 = vld [vmem:[#allocation10 + $0xf4] ss:$8 sps:$4 sm:$0xff]  }
 0x525   :  { %2234 = vmatprep.subr.bf16.mxu0 %v3529_v30 }
 0x528   :  { %2235 = vmatpush1.bf16.msra.mxu0 %v3527_v31 }
 0x529   :  { %2236 = vmatprep.subr.bf16.mxu0 %v3532_v32 }
 0x52c   :  { %2237 = vmatpush1.bf16.msra.mxu0 %v3530_v33 }
 0x52d   :  { %2238 = vmatprep.subr.bf16.mxu0 %v3535_v24 }
 0x530   :  { %2239 = vmatpush1.bf16.msra.mxu0 %v3533_v36 }
 0x531   :  { %2240 = vmatprep.subr.bf16.mxu0 %v3538_v37 }
 0x534   :  { %2241 = vmatpush1.bf16.msra.mxu0 %v3536_v38 }
 0x535   :  { %2242 = vmatprep.subr.bf16.mxu0 %v3541_v39 }
 0x538   :  { %2243 = vmatpush1.bf16.msra.mxu0 %v3539_v40 }
 0x539   :  { %2244 = vmatprep.subr.bf16.mxu0 %v3544_v41 }
 0x53c   :  { %2245 = vmatpush1.bf16.msra.mxu0 %v3542_v42 }
 0x53d   :  { %2246 = vmatprep.subr.bf16.mxu0 %v3547_v44  ;;  %v3598_v44 = vld [vmem:[#allocation7 + $0x7e4] ss:$8 sps:$4 sm:$0xff]  }
 0x540   :  { %2247 = vmatpush1.bf16.msra.mxu0 %v3545_v13  ;;  %v3596_v13 = vld [vmem:[#allocation7 + $0x7e0] ss:$8 sps:$4 sm:$0xff]  }
 0x541   :  { %2248 = vmatprep.subr.bf16.mxu0 %v3550_v57  ;;  %v3617_v57 = vld [vmem:[#allocation10 + $0x50] ss:$8 sps:$4 sm:$0xff]  }
 0x544   :  { %2249 = vmatpush1.bf16.msra.mxu0 %v3548_v58  ;;  %v3622_v58 = vld [vmem:[#allocation10 + $0x64] ss:$8 sps:$4 sm:$0xff]  }
 0x545   :  { %2250 = vmatprep.subr.bf16.mxu0 %v3553_v59  ;;  %v3620_v59 = vld [vmem:[#allocation10 + $0x60] ss:$8 sps:$4 sm:$0xff]  }
 0x548   :  { %2251 = vmatpush1.bf16.msra.mxu0 %v3551_v60  ;;  %v3625_v60 = vld [vmem:[#allocation10 + $0x74] ss:$8 sps:$4 sm:$0xff]  }
 0x5de   :  { %v1750_v49 = vpop.f32.mrb[8].mxu0 }
 0x5df   :  { %v1751_v50 = vadd.f32 %v1750_v49, %v1549_v47  ;;  %v1752_v51 = vpop.f32.mrb[9].mxu0  ;;  %v3599_v47 = vld [vmem:[#allocation7 + $0x7f0] ss:$8 sps:$4 sm:$0xff]   ;;  %v3604_v49 = vld [vmem:[#allocation10 + $0x4] ss:$8 sps:$4 sm:$0xff]  }
 0x5e0   :  { %v1753_v52 = vadd.f32 %v1752_v51, %v1553_v48  ;;  %v1754_v43 = vpop.f32.mrb[10].mxu0  ;;  %v3602_v48 = vld [vmem:[#allocation10] ss:$8 sps:$4 sm:$0xff]   ;;  %2720 = vmatprep.subr.bf16.mxu0 %v3604_v49  ;;  %v3605_v51 = vld [vmem:[#allocation10 + $0x10] ss:$8 sps:$4 sm:$0xff]  }
 0x5e1   :  { %v3972_v45 = vmax.f32 %v1751_v50, 0.0  ;;  %v1755_v53 = vpop.f32.mrb[11].mxu0  ;;  %v3607_v50 = vld [vmem:[#allocation10 + $0x14] ss:$8 sps:$4 sm:$0xff]   ;;  %v3608_v43 = vld [vmem:[#allocation10 + $0x20] ss:$8 sps:$4 sm:$0xff]  }
 0x5e2   :  { %v3974_v54 = vmax.f32 %v1753_v52, 0.0  ;;  %v3610_v52 = vld [vmem:[#allocation10 + $0x24] ss:$8 sps:$4 sm:$0xff]   ;;  %v3611_v53 = vld [vmem:[#allocation10 + $0x30] ss:$8 sps:$4 sm:$0xff]  }
 0x5e3   :  { %v1792_v56 = vpack.c.bf16 %v3972_v45, %v3972_v45 }
 0x5e4   :  { %v1793_v55 = vpack.c.bf16 %v3974_v54, %v3974_v54 }
 0x5e6   :  { %1999 = vmatprep.mubr.bf16.mxu1 %v1793_v55  ;;  %v3614_v55 = vld [vmem:[#allocation10 + $0x40] ss:$8 sps:$4 sm:$0xff]  }
 0x5e7   :  { %2000 = vmatmul.mubr.bf16.vlgmr.msra.gmra.mrb[12].mxu1 %v1792_v56  ;;  %v3619_v56 = vld [vmem:[#allocation10 + $0x54] ss:$8 sps:$4 sm:$0xff]  }
 0x5e8   :  { %2472 = vmatpush1.bf16.msra.mxu1 %v3554_v61  ;;  %v3623_v61 = vld [vmem:[#allocation10 + $0x70] ss:$8 sps:$4 sm:$0xff]  }
 0x5e9   :  { %2473 = vmatprep.subr.bf16.mxu1 %v3559_v63  ;;  %v3626_v63 = vld [vmem:[#allocation10 + $0x80] ss:$8 sps:$4 sm:$0xff]  }
 0x5ec   :  { %2474 = vmatpush1.bf16.msra.mxu1 %v3557_v0  ;;  %v3631_v0 = vld [vmem:[#allocation10 + $0x94] ss:$8 sps:$4 sm:$0xff]  }
 0x5ed   :  { %2475 = vmatprep.subr.bf16.mxu1 %v3562_v1  ;;  %v3629_v1 = vld [vmem:[#allocation10 + $0x90] ss:$8 sps:$4 sm:$0xff]  }
 0x5f0   :  { %2476 = vmatpush1.bf16.msra.mxu1 %v3560_v2  ;;  %v3634_v2 = vld [vmem:[#allocation10 + $0xa4] ss:$8 sps:$4 sm:$0xff]  }
 0x5f1   :  { %2477 = vmatprep.subr.bf16.mxu1 %v3565_v3  ;;  %v3632_v3 = vld [vmem:[#allocation10 + $0xa0] ss:$8 sps:$4 sm:$0xff]  }
 0x5f4   :  { %2478 = vmatpush1.bf16.msra.mxu1 %v3563_v4  ;;  %v3637_v4 = vld [vmem:[#allocation10 + $0xb4] ss:$8 sps:$4 sm:$0xff]  }
 0x5f5   :  { %2479 = vmatprep.subr.bf16.mxu1 %v3568_v5  ;;  %v3635_v5 = vld [vmem:[#allocation10 + $0xb0] ss:$8 sps:$4 sm:$0xff]  }
 0x5f8   :  { %2480 = vmatpush1.bf16.msra.mxu1 %v3566_v6  ;;  %v3640_v6 = vld [vmem:[#allocation10 + $0xc4] ss:$8 sps:$4 sm:$0xff]  }
 0x5f9   :  { %2481 = vmatprep.subr.bf16.mxu1 %v3571_v7  ;;  %v3638_v7 = vld [vmem:[#allocation10 + $0xc0] ss:$8 sps:$4 sm:$0xff]  }
 0x5fc   :  { %2482 = vmatpush1.bf16.msra.mxu1 %v3569_v8  ;;  %v3643_v8 = vld [vmem:[#allocation10 + $0xd4] ss:$8 sps:$4 sm:$0xff]  }
 0x5fd   :  { %2483 = vmatprep.subr.bf16.mxu1 %v3574_v9  ;;  %v3641_v9 = vld [vmem:[#allocation10 + $0xd0] ss:$8 sps:$4 sm:$0xff]  }
 0x600   :  { %2484 = vmatpush1.bf16.msra.mxu1 %v3572_v10  ;;  %v2048_v10 = vld [vmem:[#allocation8 + $0xc] sm:$0x3] }
 0x601   :  { %2485 = vmatprep.subr.bf16.mxu1 %v3577_v11  ;;  %v2053_v11 = vrot.slane %v2048_v10, %v3932_v34 }
 0x604   :  { %2486 = vmatpush1.bf16.msra.mxu1 %v3575_v12  ;;  %v2057_v12 = vrot.slane %v2048_v10, %v3935_v35 }
 0x605   :  { %2487 = vmatprep.subr.bf16.mxu1 %v3580_v14 }
 0x608   :  { %2488 = vmatpush1.bf16.msra.mxu1 %v3578_v15 }
 0x609   :  { %2489 = vmatprep.subr.bf16.mxu1 %v3583_v16 }
 0x60c   :  { %2490 = vmatpush1.bf16.msra.mxu1 %v3581_v17 }
 0x60d   :  { %2491 = vmatprep.subr.bf16.mxu1 %v3586_v18 }
 0x610   :  { %2492 = vmatpush1.bf16.msra.mxu1 %v3584_v19 }
 0x611   :  { %2493 = vmatprep.subr.bf16.mxu1 %v3589_v20 }
 0x614   :  { %2494 = vmatpush1.bf16.msra.mxu1 %v3587_v21 }
 0x615   :  { %2495 = vmatprep.subr.bf16.mxu1 %v3592_v22 }
 0x618   :  { %2496 = vmatpush1.bf16.msra.mxu1 %v3590_v23 }
 0x619   :  { %2497 = vmatprep.subr.bf16.mxu1 %v3595_v25  ;;  %v3646_v25 = vld [vmem:[#allocation10 + $0xe4] ss:$8 sps:$4 sm:$0xff]  }
 0x61c   :  { %2498 = vmatpush1.bf16.msra.mxu1 %v3593_v26  ;;  %v3644_v26 = vld [vmem:[#allocation10 + $0xe0] ss:$8 sps:$4 sm:$0xff]  }
 0x61d   :  { %2499 = vmatprep.subr.bf16.mxu1 %v3598_v44  ;;  %v2548_v44 = vld [vmem:[%s4011_s6] sm:$0x3] }
 0x620   :  { %2500 = vmatpush1.bf16.msra.mxu1 %v3596_v13  ;;  %v2553_v13 = vrot.slane %v2548_v44, %v3932_v34 }
 0x621   :  { %2501 = vmatprep.subr.bf16.mxu1 %v3601_v46  ;;  %v2557_v46 = vrot.slane %v2548_v44, %v3935_v35 }
 0x624   :  { %2502 = vmatpush1.bf16.msra.mxu1 %v3599_v47 }
 0x6ba   :  { %v2001_v30 = vpop.f32.mrb[12].mxu1 }
 0x6bb   :  { %v2002_v31 = vadd.f32 %v2001_v30, %v1800_v28  ;;  %v2003_v32 = vpop.f32.mrb[13].mxu1  ;;  %v3647_v28 = vld [vmem:[#allocation10 + $0xf0] ss:$8 sps:$4 sm:$0xff]  }
 0x6bc   :  { %v2004_v33 = vadd.f32 %v2003_v32, %v1804_v29  ;;  %v2005_v24 = vpop.f32.mrb[14].mxu1  ;;  %v2299_v29 = vld [vmem:[#allocation8 + $0xe] sm:$0x3] }
 0x6bd   :  { %v2008_v36 = vmax.f32 %v2002_v31, 0.0  ;;  %v2006_v37 = vpop.f32.mrb[15].mxu1  ;;  %v2304_v30 = vrot.slane %v2299_v29, %v3932_v34  ;;  %v2308_v31 = vrot.slane %v2299_v29, %v3935_v35 }
 0x6be   :  { %v2009_v38 = vmax.f32 %v2004_v33, 0.0 }
 0x6bf   :  { %v2010_v39 = vadd.f32 %v2008_v36, %v3972_v45  ;;  %v3613_v45 = vld [vmem:[#allocation10 + $0x34] ss:$8 sps:$4 sm:$0xff]  }
 0x6c0   :  { %v2011_v40 = vadd.f32 %v2009_v38, %v3974_v54  ;;  %v3616_v54 = vld [vmem:[#allocation10 + $0x44] ss:$8 sps:$4 sm:$0xff]  }
 0x6c1   :  { %v2045_v42 = vpack.c.bf16 %v2010_v39, %v2010_v39 }
 0x6c2   :  { %v2046_v41 = vpack.c.bf16 %v2011_v40, %v2011_v40 }
 0x6c4   :  { %2252 = vmatprep.mubr.bf16.mxu0 %v2046_v41 }
 0x6c5   :  { %2253 = vmatmul.mubr.bf16.vlgmr.msra.gmra.mrb[12].mxu0 %v2045_v42 }
 0x6c6   :  { %2721 = vmatpush1.bf16.msra.mxu0 %v3602_v48 }
 0x6c7   :  { %2722 = vmatprep.subr.bf16.mxu0 %v3607_v50 }
 0x6ca   :  { %2723 = vmatpush1.bf16.msra.mxu0 %v3605_v51 }
 0x6cb   :  { %2724 = vmatprep.subr.bf16.mxu0 %v3610_v52 }
 0x6ce   :  { %2725 = vmatpush1.bf16.msra.mxu0 %v3608_v43 }
 0x6cf   :  { %2726 = vmatprep.subr.bf16.mxu0 %v3613_v45 }
 0x6d2   :  { %2727 = vmatpush1.bf16.msra.mxu0 %v3611_v53 }
 0x6d3   :  { %2728 = vmatprep.subr.bf16.mxu0 %v3616_v54 }
 0x6d6   :  { %2729 = vmatpush1.bf16.msra.mxu0 %v3614_v55 }
 0x6d7   :  { %2730 = vmatprep.subr.bf16.mxu0 %v3619_v56 }
 0x6da   :  { %2731 = vmatpush1.bf16.msra.mxu0 %v3617_v57 }
 0x6db   :  { %2732 = vmatprep.subr.bf16.mxu0 %v3622_v58 }
 0x6de   :  { %2733 = vmatpush1.bf16.msra.mxu0 %v3620_v59 }
 0x6df   :  { %2734 = vmatprep.subr.bf16.mxu0 %v3625_v60 }
 0x6e2   :  { %2735 = vmatpush1.bf16.msra.mxu0 %v3623_v61 }
 0x6e3   :  { %2736 = vmatprep.subr.bf16.mxu0 %v3628_v62 }
 0x6e6   :  { %2737 = vmatpush1.bf16.msra.mxu0 %v3626_v63 }
 0x6e7   :  { %2738 = vmatprep.subr.bf16.mxu0 %v3631_v0 }
 0x6ea   :  { %2739 = vmatpush1.bf16.msra.mxu0 %v3629_v1 }
 0x6eb   :  { %2740 = vmatprep.subr.bf16.mxu0 %v3634_v2 }
 0x6ee   :  { %2741 = vmatpush1.bf16.msra.mxu0 %v3632_v3 }
 0x6ef   :  { %2742 = vmatprep.subr.bf16.mxu0 %v3637_v4 }
 0x6f2   :  { %2743 = vmatpush1.bf16.msra.mxu0 %v3635_v5 }
 0x6f3   :  { %2744 = vmatprep.subr.bf16.mxu0 %v3640_v6 }
 0x6f6   :  { %2745 = vmatpush1.bf16.msra.mxu0 %v3638_v7 }
 0x6f7   :  { %2746 = vmatprep.subr.bf16.mxu0 %v3643_v8 }
 0x6fa   :  { %2747 = vmatpush1.bf16.msra.mxu0 %v3641_v9 }
 0x6fb   :  { %2748 = vmatprep.subr.bf16.mxu0 %v3646_v25 }
 0x6fe   :  { %2749 = vmatpush1.bf16.msra.mxu0 %v3644_v26 }
 0x6ff   :  { %2750 = vmatprep.subr.bf16.mxu0 %v3649_v27 }
 0x702   :  { %2751 = vmatpush1.bf16.msra.mxu0 %v3647_v28 }
 0x798   :  { %v2254_v14 = vpop.f32.mrb[12].mxu0 }
 0x799   :  { %v2255_v15 = vadd.f32 %v2254_v14, %v2053_v11  ;;  %v2256_v16 = vpop.f32.mrb[13].mxu0 }
 0x79a   :  { %v2257_v17 = vadd.f32 %v2256_v16, %v2057_v12  ;;  %v2258_v18 = vpop.f32.mrb[14].mxu0 }
 0x79b   :  { %v2261_v19 = vmax.f32 %v2255_v15, 0.0  ;;  %v2259_v20 = vpop.f32.mrb[15].mxu0 }
 0x79c   :  { %v2262_v21 = vmax.f32 %v2257_v17, 0.0 }
 0x79d   :  { %v2296_v23 = vpack.c.bf16 %v2261_v19, %v2261_v19 }
 0x79e   :  { %v2297_v22 = vpack.c.bf16 %v2262_v21, %v2262_v21 }
 0x7a0   :  { %2503 = vmatprep.mubr.bf16.mxu1 %v2297_v22 }
 0x7a1   :  { %2504 = vmatmul.mubr.bf16.vlgmr.msra.gmra.mrb[16].mxu1 %v2296_v23 }
 0x874   :  { %v2505_v32 = vpop.f32.mrb[16].mxu1 }
 0x875   :  { %v2506_v33 = vadd.f32 %v2505_v32, %v2304_v30  ;;  %v2507_v24 = vpop.f32.mrb[17].mxu1 }
 0x876   :  { %v2508_v36 = vadd.f32 %v2507_v24, %v2308_v31  ;;  %v2509_v37 = vpop.f32.mrb[18].mxu1 }
 0x877   :  { %v2512_v38 = vmax.f32 %v2506_v33, 0.0  ;;  %v2510_v39 = vpop.f32.mrb[19].mxu1 }
 0x878   :  { %v2513_v40 = vmax.f32 %v2508_v36, 0.0 }
 0x879   :  { %v2546_v42 = vpack.c.bf16 %v2512_v38, %v2512_v38 }
 0x87a   :  { %v2547_v41 = vpack.c.bf16 %v2513_v40, %v2513_v40 }
 0x87c   :  { %2752 = vmatprep.mubr.bf16.mxu0 %v2547_v41 }
 0x87d   :  { %2753 = vmatmul.mubr.bf16.vlgmr.msra.gmra.mrb[16].mxu0 %v2546_v42 }
 0x950   :  { %v2754_v47 = vpop.f32.mrb[16].mxu0 }
 0x951   :  { %v2755_v48 = vadd.f32 %v2754_v47, %v2553_v13  ;;  %v2756_v49 = vpop.f32.mrb[17].mxu0 }
 0x952   :  { %v2757_v50 = vadd.f32 %v2756_v49, %v2557_v46  ;;  %v2758_v51 = vpop.f32.mrb[18].mxu0 }
 0x953   :  { %v2759_v52 = vpop.f32.mrb[19].mxu0 }
 0x954   :  { %v2763_v43 = vcombine.low %v2755_v48, %v2757_v50 }
 0x956   :  { %3126 = vst.sshfl [vmem:[#allocation11] sm:$0x33 pattern:$0x76325410] %v2763_v43 }
 0x957   :  { %3771 = shalt.err (!%p3768_p2)
}
 0x958   :  { %s3772_s21 = scalar_lea.hbm %s4012_s7, 64 }
 0x959   :  { %p3773_p3 = scmp.ne.s32.totalorder %s4012_s7, %s3772_s21  ;;  %p3776_p4 = scmp.lt.u32.totalorder %s3772_s21, %s4012_s7 }
 0x95b   :  { %p3778_p5 = pnand %p3776_p4, %p3773_p3 }
 0x95d   :  { %3781 = shalt.err (!%p3778_p5)
}
 0x95e   :  { %2782 = dma.vmem_to_hbm [thread:$0]  %s2780_s16, 64, %s4012_s7, [#allocation4]  }
 0x95f   :  { %3788 = dma.done.wait [#allocation4], 64  }
 0x960   :  { %3789 = vsyncadd [#allocation4], 4294967232 }
 0x961   :  { %2786 = vsyncpa [#allocation3], 1 }
 0x962   :  { %2787 = vsyncpa [#allocation6], 1 }
 0x963   :  { %2788 = vsyncpa [#allocation9], 1 }
 0x964   :  { %2789 = vsyncpa [#allocation4], 1 }

</bundles_post_ra>
